<compile_context>
chip_gen: v6e
topology: v6e:2x2x1
jax: 0.10.0
libtpu: 0.0.40
codegen_flags: <defaults>
</compile_context>

<pallas_src>
import jax
import jax.numpy as jnp
from jax.experimental import pallas as pl
from jax.experimental.pallas import tpu as pltpu


def mlp_kernel(x_ref,
               w1_ref, b1_ref,
               w2_ref, b2_ref,
               w3_ref, b3_ref,
               w4_ref, b4_ref,
               w5_ref, b5_ref,
               o_ref):
    """Whole forward pass fused; one grid step = one batch tile.

    x_ref:  (T, 8)  bf16   (K padded 6 -> 8)
    w1..w4: bf16 (in, out); b1..b4: (1, 64) f32
    w5_ref: (1, 64) f32 row (final layer done on VPU/XLU)
    b5_ref: (1, 1)  f32
    """
    bf16 = jnp.bfloat16

    h = jnp.dot(x_ref[...], w1_ref[...],
                preferred_element_type=jnp.float32) + b1_ref[...]
    h = jnp.maximum(h, 0.0)

    h = jnp.dot(h.astype(bf16), w2_ref[...],
                preferred_element_type=jnp.float32) + b2_ref[...]
    h = jnp.maximum(h, 0.0)

    h = jnp.dot(h.astype(bf16), w3_ref[...],
                preferred_element_type=jnp.float32) + b3_ref[...]
    h = jnp.maximum(h, 0.0)

    h = jnp.dot(h.astype(bf16), w4_ref[...],
                preferred_element_type=jnp.float32) + b4_ref[...]
    h = jnp.maximum(h, 0.0)

    # Final 64 -> 1 layer: VPU multiply + lane reduction (keeps MXU free of an
    # N=1 pass that would waste a whole matmul push for 1/128 of the columns).
    out = jnp.sum(h * w5_ref[...], axis=-1, keepdims=True) + b5_ref[...]
    o_ref[...] = out.astype(o_ref.dtype)


def net_forward(x, params, *, batch_tile=512):
    """x: (B, 6) float32 -> (B, 1) float32."""
    B, D_in = x.shape
    assert D_in == 6
    (w1, b1), (w2, b2), (w3, b3), (w4, b4), (w5, b5) = params

    # --- wrapper-side layout prep (cheap XLA ops) -------------------------
    # Pad layer-1 contraction dim 6 -> 8 (sublane granularity).
    x_p = jnp.pad(x, ((0, 0), (0, 2)))
    w1_p = jnp.pad(w1, ((0, 2), (0, 0)))

    # Pad batch up to a multiple of the tile so any batch size works.
    n_tiles = -(-B // batch_tile)            # ceil div
    B_pad = n_tiles * batch_tile
    if B_pad != B:
        x_p = jnp.pad(x_p, ((0, B_pad - B), (0, 0)))

    # bf16 MXU operands; biases & final-layer row stay f32.
    x_b = x_p.astype(jnp.bfloat16)
    w1b = w1_p.astype(jnp.bfloat16)
    w2b = w2.astype(jnp.bfloat16)
    w3b = w3.astype(jnp.bfloat16)
    w4b = w4.astype(jnp.bfloat16)
    w5_row = w5.reshape(1, 64).astype(jnp.float32)   # (64,1) -> (1,64)
    b5_sc = b5.reshape(1, 1).astype(jnp.float32)

    grid = (n_tiles,)

    # Weights/biases are broadcast: same block every grid step (pipeliner
    # skips re-DMA for unchanged block indices).
    def bcast(shape):
        return pl.BlockSpec(shape, lambda i: (0, 0))

    in_specs = [
        pl.BlockSpec((batch_tile, 8), lambda i: (i, 0)),   # x tile
        bcast(w1b.shape), bcast(b1.shape),
        bcast(w2b.shape), bcast(b2.shape),
        bcast(w3b.shape), bcast(b3.shape),
        bcast(w4b.shape), bcast(b4.shape),
        bcast(w5_row.shape), bcast(b5_sc.shape),
    ]
    out_spec = pl.BlockSpec((batch_tile, 1), lambda i: (i, 0))

    out = pl.pallas_call(
        mlp_kernel,
        out_shape=jax.ShapeDtypeStruct((B_pad, 1), jnp.float32),
        grid_spec=pltpu.PrefetchScalarGridSpec(
            num_scalar_prefetch=0,
            grid=grid,
            in_specs=in_specs,
            out_specs=out_spec,
        ),
        compiler_params=pltpu.CompilerParams(
            dimension_semantics=("parallel",),
        ),
    )(x_b, w1b, b1, w2b, b2, w3b, b3, w4b, b4, w5_row, b5_sc)

    return out[:B] if B_pad != B else out


def init_params(key):
    """Deterministic init mimicking PyTorch nn.Linear default:
    U(-1/sqrt(fan_in), 1/sqrt(fan_in)) for both weight and bias.
    Weights stored (in, out); biases (1, out)."""
    dims = [(6, 64), (64, 64), (64, 64), (64, 64), (64, 1)]
    params = []
    for (fan_in, fan_out) in dims:
        key, kw, kb = jax.random.split(key, 3)
        bound = 1.0 / jnp.sqrt(jnp.float32(fan_in))
        w = jax.random.uniform(kw, (fan_in, fan_out), jnp.float32, -bound, bound)
        b = jax.random.uniform(kb, (1, fan_out), jnp.float32, -bound, bound)
        params.append((w, b))
    return params


def reference_forward_f32(x, params):
    """Pure-f32 reference (PyTorch-equivalent semantics)."""
    h = x
    for i, (w, b) in enumerate(params):
        h = h @ w + b
        if i < len(params) - 1:
            h = jnp.maximum(h, 0.0)
    return h


def reference_forward_bf16(x, params):
    """Reference matching the kernel's numerics: bf16 matmul operands,
    f32 accumulation, f32 bias/ReLU, last layer as VPU-style reduce."""
    h = x
    for i, (w, b) in enumerate(params):
        if i < len(params) - 1:
            h = jnp.dot(h.astype(jnp.bfloat16), w.astype(jnp.bfloat16),
                        preferred_element_type=jnp.float32) + b
            h = jnp.maximum(h, 0.0)
        else:
            h = jnp.sum(h * w.reshape(1, -1).astype(jnp.float32),
                        axis=-1, keepdims=True) + b.reshape(1, 1)
    return h


if __name__ == "__main__":
    key = jax.random.PRNGKey(0)
    kp, kx = jax.random.split(key)

    params = init_params(kp)
    B = 1024                     # 2 grid steps at tile=512 -> both v7x TCs busy
    x = jax.random.normal(kx, (B, 6), jnp.float32)

    out = net_forward(x, params, batch_tile=512)
    out = jax.block_until_ready(out)
    assert out.shape == (B, 1)

    # Tight check vs a reference that mirrors the kernel's bf16-operand /
    # f32-accumulation numerics.
    ref_bf16 = reference_forward_bf16(x, params)
    assert jnp.allclose(out, ref_bf16, atol=1e-3, rtol=1e-3), \
        "mismatch vs bf16-numerics reference"

    # Loose check vs the pure-f32 PyTorch-equivalent forward.
    ref_f32 = reference_forward_f32(x, params)
    assert jnp.allclose(out, ref_f32, atol=1e-1, rtol=1e-1), \
        "mismatch vs f32 reference"

    print("KERNEL_OK")
</pallas_src>

<mosaic_0001>
module attributes {stable_mosaic.version = 11 : i64} {
  func.func @mlp_kernel(%arg0: i32, %arg1: memref<512x8xbf16, #tpu.memory_space<vmem>>, %arg2: memref<8x64xbf16, #tpu.memory_space<vmem>>, %arg3: memref<1x64xf32, #tpu.memory_space<vmem>>, %arg4: memref<64x64xbf16, #tpu.memory_space<vmem>>, %arg5: memref<1x64xf32, #tpu.memory_space<vmem>>, %arg6: memref<64x64xbf16, #tpu.memory_space<vmem>>, %arg7: memref<1x64xf32, #tpu.memory_space<vmem>>, %arg8: memref<64x64xbf16, #tpu.memory_space<vmem>>, %arg9: memref<1x64xf32, #tpu.memory_space<vmem>>, %arg10: memref<1x64xf32, #tpu.memory_space<vmem>>, %arg11: memref<1x1xf32, #tpu.memory_space<vmem>>, %arg12: memref<512x1xf32, #tpu.memory_space<vmem>>) attributes {dimension_semantics = [#tpu.dimension_semantics<parallel>], iteration_bounds = array<i64: 2>, scalar_prefetch = 0 : i64, scratch_operands = 0 : i64, tpu.core_type = #tpu.core_type<tc>, window_params = [{transform_indices = @transform_0, window_bounds = array<i64: 512, 8>}, {pipeline_mode = #tpu.pipeline_mode<synchronous>, transform_indices = @transform_1, window_bounds = array<i64: 8, 64>}, {pipeline_mode = #tpu.pipeline_mode<synchronous>, transform_indices = @transform_2, window_bounds = array<i64: 1, 64>}, {pipeline_mode = #tpu.pipeline_mode<synchronous>, transform_indices = @transform_3, window_bounds = array<i64: 64, 64>}, {pipeline_mode = #tpu.pipeline_mode<synchronous>, transform_indices = @transform_4, window_bounds = array<i64: 1, 64>}, {pipeline_mode = #tpu.pipeline_mode<synchronous>, transform_indices = @transform_5, window_bounds = array<i64: 64, 64>}, {pipeline_mode = #tpu.pipeline_mode<synchronous>, transform_indices = @transform_6, window_bounds = array<i64: 1, 64>}, {pipeline_mode = #tpu.pipeline_mode<synchronous>, transform_indices = @transform_7, window_bounds = array<i64: 64, 64>}, {pipeline_mode = #tpu.pipeline_mode<synchronous>, transform_indices = @transform_8, window_bounds = array<i64: 1, 64>}, {pipeline_mode = #tpu.pipeline_mode<synchronous>, transform_indices = @transform_9, window_bounds = array<i64: 1, 64>}, {pipeline_mode = #tpu.pipeline_mode<synchronous>, transform_indices = @transform_10, window_bounds = array<i64: 1, 1>}, {transform_indices = @transform_11, window_bounds = array<i64: 512, 1>}]} {
    %c0 = arith.constant 0 : index
    %c0_0 = arith.constant 0 : index
    %0 = vector.load %arg1[%c0, %c0_0] : memref<512x8xbf16, #tpu.memory_space<vmem>>, vector<512x8xbf16>
    %c0_1 = arith.constant 0 : index
    %c0_2 = arith.constant 0 : index
    %1 = vector.load %arg2[%c0_1, %c0_2] : memref<8x64xbf16, #tpu.memory_space<vmem>>, vector<8x64xbf16>
    %cst = arith.constant dense<0.000000e+00> : vector<512x64xf32>
    %2 = tpu.matmul %0, %1, %cst {dimension_numbers = #tpu.dot_dimension_numbers<[1], [0], [0], [1], [0, 0, 1, 1], [], []>} : vector<512x8xbf16>, vector<8x64xbf16>, vector<512x64xf32> -> vector<512x64xf32>
    %c0_3 = arith.constant 0 : index
    %c0_4 = arith.constant 0 : index
    %3 = vector.load %arg3[%c0_3, %c0_4] : memref<1x64xf32, #tpu.memory_space<vmem>>, vector<1x64xf32>
    %4 = vector.broadcast %3 : vector<1x64xf32> to vector<512x64xf32>
    %5 = arith.addf %2, %4 : vector<512x64xf32>
    %cst_5 = arith.constant 0.000000e+00 : f32
    %6 = vector.broadcast %cst_5 : f32 to vector<512x64xf32>
    %7 = arith.maximumf %5, %6 : vector<512x64xf32>
    %8 = arith.truncf %7 : vector<512x64xf32> to vector<512x64xbf16>
    %c0_6 = arith.constant 0 : index
    %c0_7 = arith.constant 0 : index
    %9 = vector.load %arg4[%c0_6, %c0_7] : memref<64x64xbf16, #tpu.memory_space<vmem>>, vector<64x64xbf16>
    %cst_8 = arith.constant dense<0.000000e+00> : vector<512x64xf32>
    %10 = tpu.matmul %8, %9, %cst_8 {dimension_numbers = #tpu.dot_dimension_numbers<[1], [0], [0], [1], [0, 0, 1, 1], [], []>} : vector<512x64xbf16>, vector<64x64xbf16>, vector<512x64xf32> -> vector<512x64xf32>
    %c0_9 = arith.constant 0 : index
    %c0_10 = arith.constant 0 : index
    %11 = vector.load %arg5[%c0_9, %c0_10] : memref<1x64xf32, #tpu.memory_space<vmem>>, vector<1x64xf32>
    %12 = vector.broadcast %11 : vector<1x64xf32> to vector<512x64xf32>
    %13 = arith.addf %10, %12 : vector<512x64xf32>
    %cst_11 = arith.constant 0.000000e+00 : f32
    %14 = vector.broadcast %cst_11 : f32 to vector<512x64xf32>
    %15 = arith.maximumf %13, %14 : vector<512x64xf32>
    %16 = arith.truncf %15 : vector<512x64xf32> to vector<512x64xbf16>
    %c0_12 = arith.constant 0 : index
    %c0_13 = arith.constant 0 : index
    %17 = vector.load %arg6[%c0_12, %c0_13] : memref<64x64xbf16, #tpu.memory_space<vmem>>, vector<64x64xbf16>
    %cst_14 = arith.constant dense<0.000000e+00> : vector<512x64xf32>
    %18 = tpu.matmul %16, %17, %cst_14 {dimension_numbers = #tpu.dot_dimension_numbers<[1], [0], [0], [1], [0, 0, 1, 1], [], []>} : vector<512x64xbf16>, vector<64x64xbf16>, vector<512x64xf32> -> vector<512x64xf32>
    %c0_15 = arith.constant 0 : index
    %c0_16 = arith.constant 0 : index
    %19 = vector.load %arg7[%c0_15, %c0_16] : memref<1x64xf32, #tpu.memory_space<vmem>>, vector<1x64xf32>
    %20 = vector.broadcast %19 : vector<1x64xf32> to vector<512x64xf32>
    %21 = arith.addf %18, %20 : vector<512x64xf32>
    %cst_17 = arith.constant 0.000000e+00 : f32
    %22 = vector.broadcast %cst_17 : f32 to vector<512x64xf32>
    %23 = arith.maximumf %21, %22 : vector<512x64xf32>
    %24 = arith.truncf %23 : vector<512x64xf32> to vector<512x64xbf16>
    %c0_18 = arith.constant 0 : index
    %c0_19 = arith.constant 0 : index
    %25 = vector.load %arg8[%c0_18, %c0_19] : memref<64x64xbf16, #tpu.memory_space<vmem>>, vector<64x64xbf16>
    %cst_20 = arith.constant dense<0.000000e+00> : vector<512x64xf32>
    %26 = tpu.matmul %24, %25, %cst_20 {dimension_numbers = #tpu.dot_dimension_numbers<[1], [0], [0], [1], [0, 0, 1, 1], [], []>} : vector<512x64xbf16>, vector<64x64xbf16>, vector<512x64xf32> -> vector<512x64xf32>
    %c0_21 = arith.constant 0 : index
    %c0_22 = arith.constant 0 : index
    %27 = vector.load %arg9[%c0_21, %c0_22] : memref<1x64xf32, #tpu.memory_space<vmem>>, vector<1x64xf32>
    %28 = vector.broadcast %27 : vector<1x64xf32> to vector<512x64xf32>
    %29 = arith.addf %26, %28 : vector<512x64xf32>
    %cst_23 = arith.constant 0.000000e+00 : f32
    %30 = vector.broadcast %cst_23 : f32 to vector<512x64xf32>
    %31 = arith.maximumf %29, %30 : vector<512x64xf32>
    %c0_24 = arith.constant 0 : index
    %c0_25 = arith.constant 0 : index
    %32 = vector.load %arg10[%c0_24, %c0_25] : memref<1x64xf32, #tpu.memory_space<vmem>>, vector<1x64xf32>
    %33 = vector.broadcast %32 : vector<1x64xf32> to vector<512x64xf32>
    %34 = arith.mulf %31, %33 : vector<512x64xf32>
    %cst_26 = arith.constant dense<0.000000e+00> : vector<512xf32>
    %35 = vector.multi_reduction <add>, %34, %cst_26 [1] : vector<512x64xf32> to vector<512xf32>
    %36 = vector.shape_cast %35 : vector<512xf32> to vector<512x1xf32>
    %c0_27 = arith.constant 0 : index
    %c0_28 = arith.constant 0 : index
    %37 = vector.load %arg11[%c0_27, %c0_28] : memref<1x1xf32, #tpu.memory_space<vmem>>, vector<1x1xf32>
    %38 = vector.broadcast %37 : vector<1x1xf32> to vector<512x1xf32>
    %39 = arith.addf %36, %38 : vector<512x1xf32>
    %c0_29 = arith.constant 0 : index
    %c0_30 = arith.constant 0 : index
    %40 = vector.load %arg12[%c0_29, %c0_30] : memref<512x1xf32, #tpu.memory_space<vmem>>, vector<512x1xf32>
    tpu.vector_store %arg12[%c0_29, %c0_30], %39 {strides = array<i32>} : memref<512x1xf32, #tpu.memory_space<vmem>>, vector<512x1xf32>,
    return
  }
  func.func @transform_0(%arg0: i32) -> (i32, i32) {
    %c0_i32 = arith.constant 0 : i32
    %c0_i32_0 = arith.constant 0 : i32
    return %arg0, %c0_i32 : i32, i32
  }
  func.func @transform_1(%arg0: i32) -> (i32, i32) {
    %c0_i32 = arith.constant 0 : i32
    %c0_i32_0 = arith.constant 0 : i32
    %c0_i32_1 = arith.constant 0 : i32
    return %c0_i32, %c0_i32_0 : i32, i32
  }
  func.func @transform_2(%arg0: i32) -> (i32, i32) {
    %c0_i32 = arith.constant 0 : i32
    %c0_i32_0 = arith.constant 0 : i32
    %c0_i32_1 = arith.constant 0 : i32
    return %c0_i32, %c0_i32_0 : i32, i32
  }
  func.func @transform_3(%arg0: i32) -> (i32, i32) {
    %c0_i32 = arith.constant 0 : i32
    %c0_i32_0 = arith.constant 0 : i32
    %c0_i32_1 = arith.constant 0 : i32
    return %c0_i32, %c0_i32_0 : i32, i32
  }
  func.func @transform_4(%arg0: i32) -> (i32, i32) {
    %c0_i32 = arith.constant 0 : i32
    %c0_i32_0 = arith.constant 0 : i32
    %c0_i32_1 = arith.constant 0 : i32
    return %c0_i32, %c0_i32_0 : i32, i32
  }
  func.func @transform_5(%arg0: i32) -> (i32, i32) {
    %c0_i32 = arith.constant 0 : i32
    %c0_i32_0 = arith.constant 0 : i32
    %c0_i32_1 = arith.constant 0 : i32
    return %c0_i32, %c0_i32_0 : i32, i32
  }
  func.func @transform_6(%arg0: i32) -> (i32, i32) {
    %c0_i32 = arith.constant 0 : i32
    %c0_i32_0 = arith.constant 0 : i32
    %c0_i32_1 = arith.constant 0 : i32
    return %c0_i32, %c0_i32_0 : i32, i32
  }
  func.func @transform_7(%arg0: i32) -> (i32, i32) {
    %c0_i32 = arith.constant 0 : i32
    %c0_i32_0 = arith.constant 0 : i32
    %c0_i32_1 = arith.constant 0 : i32
    return %c0_i32, %c0_i32_0 : i32, i32
  }
  func.func @transform_8(%arg0: i32) -> (i32, i32) {
    %c0_i32 = arith.constant 0 : i32
    %c0_i32_0 = arith.constant 0 : i32
    %c0_i32_1 = arith.constant 0 : i32
    return %c0_i32, %c0_i32_0 : i32, i32
  }
  func.func @transform_9(%arg0: i32) -> (i32, i32) {
    %c0_i32 = arith.constant 0 : i32
    %c0_i32_0 = arith.constant 0 : i32
    %c0_i32_1 = arith.constant 0 : i32
    return %c0_i32, %c0_i32_0 : i32, i32
  }
  func.func @transform_10(%arg0: i32) -> (i32, i32) {
    %c0_i32 = arith.constant 0 : i32
    %c0_i32_0 = arith.constant 0 : i32
    %c0_i32_1 = arith.constant 0 : i32
    return %c0_i32, %c0_i32_0 : i32, i32
  }
  func.func @transform_11(%arg0: i32) -> (i32, i32) {
    %c0_i32 = arith.constant 0 : i32
    %c0_i32_0 = arith.constant 0 : i32
    return %arg0, %c0_i32 : i32, i32
  }
}

</mosaic_0001>

<bundles_post_ra>
// kernel: tpu_custom_call.1
= control target key start
LH: loop header
LB: loop body
LE: loop exit
PB: predicated region body
PF: predicated region fallthrough
CT: control target
= control target key end

     0   :  { %s3831_s19 = smov 0   ;;  %s4658_s0 = inlined_call_operand.vmem [shape: bf16[1024,8], index: 0, kind: input, shape index: {}]   ;;  %s4659_s1 = inlined_call_operand.vmem [shape: bf16[8,64], index: 1, kind: input, shape index: {}]   ;;  %s4660_s2 = inlined_call_operand.vmem [shape: f32[1,64], index: 2, kind: input, shape index: {}]   ;;  %s4661_s3 = inlined_call_operand.vmem [shape: bf16[64,64], index: 3, kind: input, shape index: {}]   ;;  %s4662_s4 = inlined_call_operand.vmem [shape: f32[1,64], index: 4, kind: input, shape index: {}]   ;;  %s4663_s5 = inlined_call_operand.vmem [shape: bf16[64,64], index: 5, kind: input, shape index: {}]   ;;  %s4664_s6 = inlined_call_operand.vmem [shape: f32[1,64], index: 6, kind: input, shape index: {}]   ;;  %s4665_s7 = inlined_call_operand.vmem [shape: bf16[64,64], index: 7, kind: input, shape index: {}]   ;;  %s4666_s8 = inlined_call_operand.vmem [shape: f32[1,64], index: 8, kind: input, shape index: {}]   ;;  %s4667_s9 = inlined_call_operand.vmem [shape: f32[1,64], index: 9, kind: input, shape index: {}]   ;;  %s4668_s10 = inlined_call_operand.<no memory space> [shape: f32[1,1], index: 10, kind: input, shape index: {}]   ;;  %s4669_s11 = inlined_call_operand.vmem [shape: f32[1024,1], index: 11, kind: output, shape index: {}]  }
   0x1   :  { %v16_v0 = vstv %s4668_s10 }
   0x2   :  { %17 = vst [vmem:[#allocation2] sm:$0x1] %v16_v0 }
   0x3 LB: > { %s3095_s20 = sadd.s32 4294967295, %s3766_s19   ;;  %p3099_p0 = scmp.ge.s32.totalorder %s3766_s19, 1  ;;  %s3766_s19 = sphi %s3831_s19, %s23_s19  }
   0x4   : > { %p340_p1 = scmp.lt.s32.totalorder %s3766_s19, 3 }
   0x6   : > { %p341_p2 = pnand %p3099_p0, %p340_p1 }
   0x7   : > { %s3100_s10 = sshll.u32 (!%p341_p2), %s3095_s20, 6 }
   0x8   : > { %344 = sbr.rel (%p341_p2) target bundleno = 1107 (0x453), region = 64  ;;  %p381_p3 = scmp.lt.s32.totalorder (!%p341_p2), %s3100_s10, 127 }
   0xd   : > { %v457_v1 = vld [vmem:[%s4659_s1] sm:$0xf]  ;;  %vm722_vm0 = vcmask 1043456   ;;  %v3748_v3 = vld [vmem:[%s4661_s3 + $0x18] sm:$0xff]   ;;  %s4671_s10 = smov (!%p381_p3, %s3100_s10), 127  ;;  %vm625_vm1 = vcmask 64512  }
   0xe   : > { %3707 = vmatprep.subr.msk.bf16.mxu0 %vm722_vm0, %v457_v1  ;;  %v724_v2 = vsel %vm722_vm0, %v457_v1, 0  ;;  %3491 = vmatprep.subr.bf16.mxu1 %v3748_v3  ;;  %s3101_s25 = sshll.u32 %s4671_s10, 2  ;;  %v3749_v23 = vld [vmem:[%s4661_s3 + $0x10] sm:$0xff]   ;;  %v3750_v25 = vld [vmem:[%s4661_s3 + $0x8] sm:$0xff]   ;;  %v3751_v27 = vld [vmem:[%s4661_s3] sm:$0xff]   ;;  %vm1150_vm2 = vcmask 523264  }
   0xf   : > { %3426 = vmatpush3.bf16.msra.mxu0 %v724_v2  ;;  %3492 = vmatpush3.bf16.msra.mxu1 %v3748_v3  ;;  %s3851_s28 = scalar_lea.vmem %s4658_s0, %s3101_s25  ;;  %v3752_v39 = vld [vmem:[%s4663_s5 + $0x18] sm:$0xff]   ;;  %v3753_v40 = vld [vmem:[%s4663_s5 + $0x10] sm:$0xff]   ;;  %v3935_v43 = vld [vmem:[%s4660_s2] ss:$0 sm:$0xff]  ;;  %s3103_s25 = sshll.u32 %s4671_s10, 3  ;;  %vm2974_vm3 = vcmask 7168  }
  0x10   : > { %v3716_v4 = vld [vmem:[%s3851_s28] sm:$0xff]   ;;  %v3717_v5 = vld [vmem:[%s3851_s28 + $0x8] sm:$0xff]   ;;  %v3718_v6 = vld [vmem:[%s3851_s28 + $0x10] sm:$0xff]   ;;  %3493 = vmatprep.subr.bf16.mxu1 %v3749_v23  ;;  %3563 = vmatprep.subr.bf16.mxu0 %v3752_v39 }
  0x11   : > { %3427 = vmatprep.mubr.msk.bf16.mxu0 %vm625_vm1, %v3716_v4  ;;  %v3719_v7 = vld [vmem:[%s3851_s28 + $0x18] sm:$0xff]   ;;  %v3720_v8 = vld [vmem:[%s3851_s28 + $0x20] sm:$0xff]   ;;  %v3721_v9 = vld [vmem:[%s3851_s28 + $0x28] sm:$0xff]  }
  0x12   : > { %3428 = vmatmul.mubr.msk.bf16.vlgmr.msra.gmra.mxu0 %vm625_vm1, %v3717_v5  ;;  %v3722_v10 = vld [vmem:[%s3851_s28 + $0x30] sm:$0xff]   ;;  %v3723_v11 = vld [vmem:[%s3851_s28 + $0x38] sm:$0xff]   ;;  %v3724_v12 = vld [vmem:[%s3851_s28 + $0x40] sm:$0xff]  }
  0x13   : > { %3431 = vmatprep.mubr.msk.bf16.mxu0 %vm625_vm1, %v3718_v6  ;;  %v3725_v13 = vld [vmem:[%s3851_s28 + $0x48] sm:$0xff]   ;;  %v3726_v14 = vld [vmem:[%s3851_s28 + $0x50] sm:$0xff]   ;;  %v3727_v15 = vld [vmem:[%s3851_s28 + $0x58] sm:$0xff]   ;;  %3494 = vmatpush3.bf16.msra.mxu1 %v3749_v23 }
  0x14   : > { %v3728_v16 = vld [vmem:[%s3851_s28 + $0x60] sm:$0xff]   ;;  %v3729_v17 = vld [vmem:[%s3851_s28 + $0x68] sm:$0xff]   ;;  %v3730_v18 = vld [vmem:[%s3851_s28 + $0x70] sm:$0xff]   ;;  %3495 = vmatprep.subr.bf16.mxu1 %v3750_v25  ;;  %3564 = vmatpush3.bf16.msra.mxu0 %v3752_v39 }
  0x15   : > { %v3731_v19 = vld [vmem:[%s3851_s28 + $0x78] sm:$0xff]   ;;  %v3732_v20 = vld [vmem:[%s3851_s28 + $0x80] sm:$0xff]   ;;  %v3733_v21 = vld [vmem:[%s3851_s28 + $0x88] sm:$0xff]   ;;  %3565 = vmatprep.subr.bf16.mxu0 %v3753_v40 }
  0x16   : > { %v3734_v22 = vld [vmem:[%s3851_s28 + $0x90] sm:$0xff]   ;;  %v3735_v24 = vld [vmem:[%s3851_s28 + $0x98] sm:$0xff]   ;;  %v3736_v26 = vld [vmem:[%s3851_s28 + $0xa0] sm:$0xff]  }
  0x17   : > { %3496 = vmatpush3.bf16.msra.mxu1 %v3750_v25  ;;  %v3737_v28 = vld [vmem:[%s3851_s28 + $0xa8] sm:$0xff]   ;;  %v3738_v29 = vld [vmem:[%s3851_s28 + $0xb0] sm:$0xff]   ;;  %v3739_v30 = vld [vmem:[%s3851_s28 + $0xb8] sm:$0xff]  }
  0x18   : > { %3497 = vmatprep.subr.bf16.mxu1 %v3751_v27  ;;  %v3740_v31 = vld [vmem:[%s3851_s28 + $0xc0] sm:$0xff]   ;;  %v3741_v32 = vld [vmem:[%s3851_s28 + $0xc8] sm:$0xff]   ;;  %v3742_v33 = vld [vmem:[%s3851_s28 + $0xd0] sm:$0xff]   ;;  %3566 = vmatpush3.bf16.msra.mxu0 %v3753_v40 }
  0x19   : > { %v3743_v34 = vld [vmem:[%s3851_s28 + $0xd8] sm:$0xff]   ;;  %v3744_v35 = vld [vmem:[%s3851_s28 + $0xe0] sm:$0xff]   ;;  %v3745_v36 = vld [vmem:[%s3851_s28 + $0xe8] sm:$0xff]  }
  0x1a   : > { %3432 = vmatmul.mubr.msk.bf16.gmra.mxu0 %vm625_vm1, %v3719_v7  ;;  %v3746_v37 = vld [vmem:[%s3851_s28 + $0xf0] sm:$0xff]   ;;  %v3747_v38 = vld [vmem:[%s3851_s28 + $0xf8] sm:$0xff]   ;;  %v3754_v49 = vld [vmem:[%s4663_s5 + $0x8] sm:$0xff]   ;;  %s4461_s28 = scalar_lea.vmem %s4669_s11, %s3103_s25 }
  0x1b   : > { %3435 = vmatprep.mubr.msk.bf16.mxu0 %vm625_vm1, %v3720_v8  ;;  %3498 = vmatpush3.bf16.msra.mxu1 %v3751_v27  ;;  %v3755_v50 = vld [vmem:[%s4663_s5] sm:$0xff]  }
  0x1c   : > { %3567 = vmatprep.subr.bf16.mxu0 %v3754_v49 }
  0x1d   : > { %3568 = vmatpush3.bf16.msra.mxu0 %v3754_v49 }
  0x1e   : > { %3569 = vmatprep.subr.bf16.mxu0 %v3755_v50 }
  0x21   : > { %3570 = vmatpush3.bf16.msra.mxu0 %v3755_v50 }
  0x22   : > { %3436 = vmatmul.mubr.msk.bf16.gmra.mxu0 %vm625_vm1, %v3721_v9 }
  0x23   : > { %3439 = vmatprep.mubr.msk.bf16.mxu0 %vm625_vm1, %v3722_v10 }
  0x2a   : > { %3440 = vmatmul.mubr.msk.bf16.gmra.mxu0 %vm625_vm1, %v3723_v11 }
  0x2b   : > { %3443 = vmatprep.mubr.msk.bf16.mxu0 %vm625_vm1, %v3724_v12 }
  0x32   : > { %3444 = vmatmul.mubr.msk.bf16.gmra.mxu0 %vm625_vm1, %v3725_v13 }
  0x33   : > { %3447 = vmatprep.mubr.msk.bf16.mxu0 %vm625_vm1, %v3726_v14 }
  0x3a   : > { %3448 = vmatmul.mubr.msk.bf16.gmra.mxu0 %vm625_vm1, %v3727_v15 }
  0x3b   : > { %3451 = vmatprep.mubr.msk.bf16.mxu0 %vm625_vm1, %v3728_v16 }
  0x42   : > { %3452 = vmatmul.mubr.msk.bf16.gmra.mxu0 %vm625_vm1, %v3729_v17 }
  0x43   : > { %3455 = vmatprep.mubr.msk.bf16.mxu0 %vm625_vm1, %v3730_v18 }
  0x4a   : > { %3456 = vmatmul.mubr.msk.bf16.gmra.mxu0 %vm625_vm1, %v3731_v19 }
  0x4b   : > { %3459 = vmatprep.mubr.msk.bf16.mxu0 %vm625_vm1, %v3732_v20 }
  0x52   : > { %3460 = vmatmul.mubr.msk.bf16.gmra.mxu0 %vm625_vm1, %v3733_v21 }
  0x53   : > { %3463 = vmatprep.mubr.msk.bf16.mxu0 %vm625_vm1, %v3734_v22 }
  0x5a   : > { %3464 = vmatmul.mubr.msk.bf16.gmra.mxu0 %vm625_vm1, %v3735_v24 }
  0x5b   : > { %3467 = vmatprep.mubr.msk.bf16.mxu0 %vm625_vm1, %v3736_v26 }
  0x62   : > { %3468 = vmatmul.mubr.msk.bf16.gmra.mxu0 %vm625_vm1, %v3737_v28 }
  0x63   : > { %3471 = vmatprep.mubr.msk.bf16.mxu0 %vm625_vm1, %v3738_v29 }
  0x6a   : > { %3472 = vmatmul.mubr.msk.bf16.gmra.mxu0 %vm625_vm1, %v3739_v30 }
  0x6b   : > { %3475 = vmatprep.mubr.msk.bf16.mxu0 %vm625_vm1, %v3740_v31 }
  0x72   : > { %3476 = vmatmul.mubr.msk.bf16.gmra.mxu0 %vm625_vm1, %v3741_v32 }
  0x73   : > { %3479 = vmatprep.mubr.msk.bf16.mxu0 %vm625_vm1, %v3742_v33 }
  0x7a   : > { %3480 = vmatmul.mubr.msk.bf16.gmra.mxu0 %vm625_vm1, %v3743_v34 }
  0x7b   : > { %3483 = vmatprep.mubr.msk.bf16.mxu0 %vm625_vm1, %v3744_v35 }
  0x82   : > { %3484 = vmatmul.mubr.msk.bf16.gmra.mxu0 %vm625_vm1, %v3745_v36 }
  0x83   : > { %3487 = vmatprep.mubr.msk.bf16.mxu0 %vm625_vm1, %v3746_v37 }
  0x8a   : > { %3488 = vmatmul.mubr.msk.bf16.gmra.mxu0 %vm625_vm1, %v3747_v38 }
  0xd2   : > { %v3429_v41 = vpop.f32.mrf.mxu0 }
  0xd3   : > { %v769_v47 = vadd.f32 %v3429_v41, %v3935_v43 }
  0xd4   : > { %v760_v42 = vpop.f32.mrf.mxu0 }
  0xd5   : > { %v761_v45 = vadd.f32 %v3935_v43, %v760_v42  ;;  %v1017_v56 = vmax.f32 %v769_v47, 0.0 }
  0xd6   : > { %v3430_v44 = vpop.f32.mrf.mxu0 }
  0xd7   : > { %v772_v46 = vadd.f32 %v3430_v44, %v3935_v43  ;;  %v1015_v54 = vmax.f32 %v761_v45, 0.0 }
  0xd8   : > { %v763_v48 = vpop.f32.mrf.mxu0 }
  0xd9   : > { %v764_v51 = vadd.f32 %v3935_v43, %v763_v48  ;;  %v1018_v52 = vmax.f32 %v772_v46, 0.0 }
  0xda   : > { %v3433_v53 = vpop.f32.mrf.mxu0 }
  0xdb   : > { %v1016_v55 = vmax.f32 %v764_v51, 0.0  ;;  %v1080_v59 = vpack.c.bf16 %v1018_v52, %v1017_v56  ;;  %v785_v63 = vadd.f32 %v3433_v53, %v3935_v43 }
  0xdc   : > { %v776_v57 = vpop.f32.mrf.mxu0 }
  0xdd   : > { %v1079_v58 = vpack.c.bf16 %v1016_v55, %v1015_v54  ;;  %v777_v61 = vadd.f32 %v3935_v43, %v776_v57  ;;  %v1021_v6 = vmax.f32 %v785_v63, 0.0 }
  0xde   : > { %v3434_v60 = vpop.f32.mrf.mxu0 }
  0xdf   : > { %v788_v62 = vadd.f32 %v3434_v60, %v3935_v43  ;;  %3499 = vmatprep.mubr.msk.bf16.mxu1 %vm1150_vm2, %v1079_v58  ;;  %v1019_v4 = vmax.f32 %v777_v61, 0.0 }
  0xe0   : > { %v779_v0 = vpop.f32.mrf.mxu0  ;;  %3500 = vmatmul.mubr.msk.bf16.vlgmr.msra.gmra.mxu1 %vm1150_vm2, %v1080_v59 }
  0xe1   : > { %v780_v1 = vadd.f32 %v3935_v43, %v779_v0  ;;  %v1022_v2 = vmax.f32 %v788_v62, 0.0 }
  0xe2   : > { %v3437_v3 = vpop.f32.mrf.mxu0 }
  0xe3   : > { %v1020_v5 = vmax.f32 %v780_v1, 0.0  ;;  %v1082_v9 = vpack.c.bf16 %v1022_v2, %v1021_v6  ;;  %v801_v13 = vadd.f32 %v3437_v3, %v3935_v43 }
  0xe4   : > { %v792_v7 = vpop.f32.mrf.mxu0 }
  0xe5   : > { %v1081_v8 = vpack.c.bf16 %v1020_v5, %v1019_v4  ;;  %v793_v11 = vadd.f32 %v3935_v43, %v792_v7  ;;  %v1025_v20 = vmax.f32 %v801_v13, 0.0 }
  0xe6   : > { %v3438_v10 = vpop.f32.mrf.mxu0 }
  0xe7   : > { %v804_v12 = vadd.f32 %v3438_v10, %v3935_v43  ;;  %3503 = vmatprep.mubr.msk.bf16.mxu1 %vm1150_vm2, %v1081_v8  ;;  %v1023_v18 = vmax.f32 %v793_v11, 0.0 }
  0xe8   : > { %v795_v14 = vpop.f32.mrf.mxu0  ;;  %3504 = vmatmul.mubr.msk.bf16.gmra.mxu1 %vm1150_vm2, %v1082_v9 }
  0xe9   : > { %v796_v15 = vadd.f32 %v3935_v43, %v795_v14  ;;  %v1026_v16 = vmax.f32 %v804_v12, 0.0 }
  0xea   : > { %v3441_v17 = vpop.f32.mrf.mxu0 }
  0xeb   : > { %v1024_v19 = vmax.f32 %v796_v15, 0.0  ;;  %v1084_v23 = vpack.c.bf16 %v1026_v16, %v1025_v20  ;;  %v817_v27 = vadd.f32 %v3441_v17, %v3935_v43 }
  0xec   : > { %v808_v21 = vpop.f32.mrf.mxu0 }
  0xed   : > { %v1083_v22 = vpack.c.bf16 %v1024_v19, %v1023_v18  ;;  %v809_v25 = vadd.f32 %v3935_v43, %v808_v21  ;;  %v1029_v34 = vmax.f32 %v817_v27, 0.0 }
  0xee   : > { %v3442_v24 = vpop.f32.mrf.mxu0 }
  0xef   : > { %v820_v26 = vadd.f32 %v3442_v24, %v3935_v43  ;;  %3507 = vmatprep.mubr.msk.bf16.mxu1 %vm1150_vm2, %v1083_v22  ;;  %v1027_v32 = vmax.f32 %v809_v25, 0.0 }
  0xf0   : > { %v811_v28 = vpop.f32.mrf.mxu0  ;;  %3508 = vmatmul.mubr.msk.bf16.gmra.mxu1 %vm1150_vm2, %v1084_v23 }
  0xf1   : > { %v812_v29 = vadd.f32 %v3935_v43, %v811_v28  ;;  %v1030_v30 = vmax.f32 %v820_v26, 0.0 }
  0xf2   : > { %v3445_v31 = vpop.f32.mrf.mxu0 }
  0xf3   : > { %v1028_v33 = vmax.f32 %v812_v29, 0.0  ;;  %v1086_v37 = vpack.c.bf16 %v1030_v30, %v1029_v34  ;;  %v833_v41 = vadd.f32 %v3445_v31, %v3935_v43 }
  0xf4   : > { %v824_v35 = vpop.f32.mrf.mxu0 }
  0xf5   : > { %v1085_v36 = vpack.c.bf16 %v1028_v33, %v1027_v32  ;;  %v825_v39 = vadd.f32 %v3935_v43, %v824_v35  ;;  %v1033_v49 = vmax.f32 %v833_v41, 0.0 }
  0xf6   : > { %v3446_v38 = vpop.f32.mrf.mxu0 }
  0xf7   : > { %v836_v40 = vadd.f32 %v3446_v38, %v3935_v43  ;;  %3511 = vmatprep.mubr.msk.bf16.mxu1 %vm1150_vm2, %v1085_v36  ;;  %v1031_v47 = vmax.f32 %v825_v39, 0.0 }
  0xf8   : > { %v827_v42 = vpop.f32.mrf.mxu0  ;;  %3512 = vmatmul.mubr.msk.bf16.gmra.mxu1 %vm1150_vm2, %v1086_v37 }
  0xf9   : > { %v828_v44 = vadd.f32 %v3935_v43, %v827_v42  ;;  %v1034_v45 = vmax.f32 %v836_v40, 0.0 }
  0xfa   : > { %v3449_v46 = vpop.f32.mrf.mxu0 }
  0xfb   : > { %v1032_v48 = vmax.f32 %v828_v44, 0.0  ;;  %v1088_v52 = vpack.c.bf16 %v1034_v45, %v1033_v49  ;;  %v849_v56 = vadd.f32 %v3449_v46, %v3935_v43 }
  0xfc   : > { %v840_v50 = vpop.f32.mrf.mxu0 }
  0xfd   : > { %v1087_v51 = vpack.c.bf16 %v1032_v48, %v1031_v47  ;;  %v841_v54 = vadd.f32 %v3935_v43, %v840_v50  ;;  %v1037_v63 = vmax.f32 %v849_v56, 0.0 }
  0xfe   : > { %v3450_v53 = vpop.f32.mrf.mxu0 }
  0xff   : > { %v852_v55 = vadd.f32 %v3450_v53, %v3935_v43  ;;  %3515 = vmatprep.mubr.msk.bf16.mxu1 %vm1150_vm2, %v1087_v51  ;;  %v1035_v61 = vmax.f32 %v841_v54, 0.0 }
 0x100   : > { %v843_v57 = vpop.f32.mrf.mxu0  ;;  %3516 = vmatmul.mubr.msk.bf16.gmra.mxu1 %vm1150_vm2, %v1088_v52 }
 0x101   : > { %v844_v58 = vadd.f32 %v3935_v43, %v843_v57  ;;  %v1038_v59 = vmax.f32 %v852_v55, 0.0 }
 0x102   : > { %v3453_v60 = vpop.f32.mrf.mxu0 }
 0x103   : > { %v1036_v62 = vmax.f32 %v844_v58, 0.0  ;;  %v1090_v2 = vpack.c.bf16 %v1038_v59, %v1037_v63  ;;  %v865_v6 = vadd.f32 %v3453_v60, %v3935_v43 }
 0x104   : > { %v856_v0 = vpop.f32.mrf.mxu0 }
 0x105   : > { %v1089_v1 = vpack.c.bf16 %v1036_v62, %v1035_v61  ;;  %v857_v4 = vadd.f32 %v3935_v43, %v856_v0  ;;  %v1041_v13 = vmax.f32 %v865_v6, 0.0 }
 0x106   : > { %v3454_v3 = vpop.f32.mrf.mxu0 }
 0x107   : > { %v868_v5 = vadd.f32 %v3454_v3, %v3935_v43  ;;  %3519 = vmatprep.mubr.msk.bf16.mxu1 %vm1150_vm2, %v1089_v1  ;;  %v1039_v11 = vmax.f32 %v857_v4, 0.0 }
 0x108   : > { %v859_v7 = vpop.f32.mrf.mxu0  ;;  %3520 = vmatmul.mubr.msk.bf16.gmra.mxu1 %vm1150_vm2, %v1090_v2 }
 0x109   : > { %v860_v8 = vadd.f32 %v3935_v43, %v859_v7  ;;  %v1042_v9 = vmax.f32 %v868_v5, 0.0 }
 0x10a   : > { %v3457_v10 = vpop.f32.mrf.mxu0 }
 0x10b   : > { %v1040_v12 = vmax.f32 %v860_v8, 0.0  ;;  %v1092_v16 = vpack.c.bf16 %v1042_v9, %v1041_v13  ;;  %v881_v20 = vadd.f32 %v3457_v10, %v3935_v43 }
 0x10c   : > { %v872_v14 = vpop.f32.mrf.mxu0 }
 0x10d   : > { %v1091_v15 = vpack.c.bf16 %v1040_v12, %v1039_v11  ;;  %v873_v18 = vadd.f32 %v3935_v43, %v872_v14  ;;  %v1045_v27 = vmax.f32 %v881_v20, 0.0 }
 0x10e   : > { %v3458_v17 = vpop.f32.mrf.mxu0 }
 0x10f   : > { %v884_v19 = vadd.f32 %v3458_v17, %v3935_v43  ;;  %3523 = vmatprep.mubr.msk.bf16.mxu1 %vm1150_vm2, %v1091_v15  ;;  %v1043_v25 = vmax.f32 %v873_v18, 0.0 }
 0x110   : > { %v875_v21 = vpop.f32.mrf.mxu0  ;;  %3524 = vmatmul.mubr.msk.bf16.gmra.mxu1 %vm1150_vm2, %v1092_v16 }
 0x111   : > { %v876_v22 = vadd.f32 %v3935_v43, %v875_v21  ;;  %v1046_v23 = vmax.f32 %v884_v19, 0.0 }
 0x112   : > { %v3461_v24 = vpop.f32.mrf.mxu0 }
 0x113   : > { %v1044_v26 = vmax.f32 %v876_v22, 0.0  ;;  %v1094_v30 = vpack.c.bf16 %v1046_v23, %v1045_v27  ;;  %v897_v34 = vadd.f32 %v3461_v24, %v3935_v43 }
 0x114   : > { %v888_v28 = vpop.f32.mrf.mxu0 }
 0x115   : > { %v1093_v29 = vpack.c.bf16 %v1044_v26, %v1043_v25  ;;  %v889_v32 = vadd.f32 %v3935_v43, %v888_v28  ;;  %v1049_v41 = vmax.f32 %v897_v34, 0.0 }
 0x116   : > { %v3462_v31 = vpop.f32.mrf.mxu0 }
 0x117   : > { %v900_v33 = vadd.f32 %v3462_v31, %v3935_v43  ;;  %3527 = vmatprep.mubr.msk.bf16.mxu1 %vm1150_vm2, %v1093_v29  ;;  %v1047_v39 = vmax.f32 %v889_v32, 0.0 }
 0x118   : > { %v891_v35 = vpop.f32.mrf.mxu0  ;;  %3528 = vmatmul.mubr.msk.bf16.gmra.mxu1 %vm1150_vm2, %v1094_v30 }
 0x119   : > { %v892_v36 = vadd.f32 %v3935_v43, %v891_v35  ;;  %v1050_v37 = vmax.f32 %v900_v33, 0.0 }
 0x11a   : > { %v3465_v38 = vpop.f32.mrf.mxu0 }
 0x11b   : > { %v1048_v40 = vmax.f32 %v892_v36, 0.0  ;;  %v1096_v45 = vpack.c.bf16 %v1050_v37, %v1049_v41  ;;  %v913_v49 = vadd.f32 %v3465_v38, %v3935_v43 }
 0x11c   : > { %v904_v42 = vpop.f32.mrf.mxu0 }
 0x11d   : > { %v1095_v44 = vpack.c.bf16 %v1048_v40, %v1047_v39  ;;  %v905_v47 = vadd.f32 %v3935_v43, %v904_v42  ;;  %v1053_v56 = vmax.f32 %v913_v49, 0.0 }
 0x11e   : > { %v3466_v46 = vpop.f32.mrf.mxu0 }
 0x11f   : > { %v916_v48 = vadd.f32 %v3466_v46, %v3935_v43  ;;  %3531 = vmatprep.mubr.msk.bf16.mxu1 %vm1150_vm2, %v1095_v44  ;;  %v1051_v54 = vmax.f32 %v905_v47, 0.0 }
 0x120   : > { %v907_v50 = vpop.f32.mrf.mxu0  ;;  %3532 = vmatmul.mubr.msk.bf16.gmra.mxu1 %vm1150_vm2, %v1096_v45 }
 0x121   : > { %v908_v51 = vadd.f32 %v3935_v43, %v907_v50  ;;  %v1054_v52 = vmax.f32 %v916_v48, 0.0 }
 0x122   : > { %v3469_v53 = vpop.f32.mrf.mxu0 }
 0x123   : > { %v1052_v55 = vmax.f32 %v908_v51, 0.0  ;;  %v1098_v59 = vpack.c.bf16 %v1054_v52, %v1053_v56  ;;  %v929_v63 = vadd.f32 %v3469_v53, %v3935_v43 }
 0x124   : > { %v920_v57 = vpop.f32.mrf.mxu0 }
 0x125   : > { %v1097_v58 = vpack.c.bf16 %v1052_v55, %v1051_v54  ;;  %v921_v61 = vadd.f32 %v3935_v43, %v920_v57  ;;  %v1057_v6 = vmax.f32 %v929_v63, 0.0 }
 0x126   : > { %v3470_v60 = vpop.f32.mrf.mxu0 }
 0x127   : > { %v932_v62 = vadd.f32 %v3470_v60, %v3935_v43  ;;  %3535 = vmatprep.mubr.msk.bf16.mxu1 %vm1150_vm2, %v1097_v58  ;;  %v1055_v4 = vmax.f32 %v921_v61, 0.0 }
 0x128   : > { %v923_v0 = vpop.f32.mrf.mxu0  ;;  %3536 = vmatmul.mubr.msk.bf16.gmra.mxu1 %vm1150_vm2, %v1098_v59 }
 0x129   : > { %v924_v1 = vadd.f32 %v3935_v43, %v923_v0  ;;  %v1058_v2 = vmax.f32 %v932_v62, 0.0 }
 0x12a   : > { %v3473_v3 = vpop.f32.mrf.mxu0 }
 0x12b   : > { %v1056_v5 = vmax.f32 %v924_v1, 0.0  ;;  %v1100_v9 = vpack.c.bf16 %v1058_v2, %v1057_v6  ;;  %v945_v13 = vadd.f32 %v3473_v3, %v3935_v43 }
 0x12c   : > { %v936_v7 = vpop.f32.mrf.mxu0 }
 0x12d   : > { %v1099_v8 = vpack.c.bf16 %v1056_v5, %v1055_v4  ;;  %v937_v11 = vadd.f32 %v3935_v43, %v936_v7  ;;  %v1061_v20 = vmax.f32 %v945_v13, 0.0 }
 0x12e   : > { %v3474_v10 = vpop.f32.mrf.mxu0 }
 0x12f   : > { %v948_v12 = vadd.f32 %v3474_v10, %v3935_v43  ;;  %3539 = vmatprep.mubr.msk.bf16.mxu1 %vm1150_vm2, %v1099_v8  ;;  %v1059_v18 = vmax.f32 %v937_v11, 0.0 }
 0x130   : > { %v939_v14 = vpop.f32.mrf.mxu0  ;;  %3540 = vmatmul.mubr.msk.bf16.gmra.mxu1 %vm1150_vm2, %v1100_v9 }
 0x131   : > { %v940_v15 = vadd.f32 %v3935_v43, %v939_v14  ;;  %v1062_v16 = vmax.f32 %v948_v12, 0.0 }
 0x132   : > { %v3477_v17 = vpop.f32.mrf.mxu0 }
 0x133   : > { %v1060_v19 = vmax.f32 %v940_v15, 0.0  ;;  %v1102_v23 = vpack.c.bf16 %v1062_v16, %v1061_v20  ;;  %v961_v27 = vadd.f32 %v3477_v17, %v3935_v43  ;;  %v3756_v15 = vld [vmem:[%s4665_s7 + $0x18] sm:$0xff]  }
 0x134   : > { %v952_v21 = vpop.f32.mrf.mxu0  ;;  %3635 = vmatprep.subr.bf16.mxu1 %v3756_v15 }
 0x135   : > { %v1101_v22 = vpack.c.bf16 %v1060_v19, %v1059_v18  ;;  %v953_v25 = vadd.f32 %v3935_v43, %v952_v21  ;;  %v1065_v34 = vmax.f32 %v961_v27, 0.0  ;;  %3636 = vmatpush3.bf16.msra.mxu1 %v3756_v15  ;;  %v4048_v18 = vld [vmem:[%s4662_s4] ss:$0 sm:$0xff] }
 0x136   : > { %v3478_v24 = vpop.f32.mrf.mxu0 }
 0x137   : > { %v964_v26 = vadd.f32 %v3478_v24, %v3935_v43  ;;  %3543 = vmatprep.mubr.msk.bf16.mxu1 %vm1150_vm2, %v1101_v22  ;;  %v1063_v32 = vmax.f32 %v953_v25, 0.0  ;;  %v3758_v24 = vld [vmem:[%s4665_s7 + $0x8] sm:$0xff]   ;;  %v3759_v25 = vld [vmem:[%s4665_s7] sm:$0xff]  }
 0x138   : > { %v955_v28 = vpop.f32.mrf.mxu0  ;;  %3544 = vmatmul.mubr.msk.bf16.gmra.mxu1 %vm1150_vm2, %v1102_v23 }
 0x139   : > { %v956_v29 = vadd.f32 %v3935_v43, %v955_v28  ;;  %v1066_v30 = vmax.f32 %v964_v26, 0.0 }
 0x13a   : > { %v3481_v31 = vpop.f32.mrf.mxu0 }
 0x13b   : > { %v1064_v33 = vmax.f32 %v956_v29, 0.0  ;;  %v1104_v37 = vpack.c.bf16 %v1066_v30, %v1065_v34  ;;  %v977_v41 = vadd.f32 %v3481_v31, %v3935_v43 }
 0x13c   : > { %v968_v35 = vpop.f32.mrf.mxu0 }
 0x13d   : > { %v1103_v36 = vpack.c.bf16 %v1064_v33, %v1063_v32  ;;  %v969_v39 = vadd.f32 %v3935_v43, %v968_v35  ;;  %v1069_v49 = vmax.f32 %v977_v41, 0.0 }
 0x13e   : > { %v3482_v38 = vpop.f32.mrf.mxu0 }
 0x13f   : > { %v980_v40 = vadd.f32 %v3482_v38, %v3935_v43  ;;  %3547 = vmatprep.mubr.msk.bf16.mxu1 %vm1150_vm2, %v1103_v36  ;;  %v1067_v47 = vmax.f32 %v969_v39, 0.0 }
 0x140   : > { %v971_v42 = vpop.f32.mrf.mxu0  ;;  %3548 = vmatmul.mubr.msk.bf16.gmra.mxu1 %vm1150_vm2, %v1104_v37 }
 0x141   : > { %v972_v44 = vadd.f32 %v3935_v43, %v971_v42  ;;  %v1070_v45 = vmax.f32 %v980_v40, 0.0 }
 0x142   : > { %v3485_v46 = vpop.f32.mrf.mxu0 }
 0x143   : > { %v1068_v48 = vmax.f32 %v972_v44, 0.0  ;;  %v1106_v52 = vpack.c.bf16 %v1070_v45, %v1069_v49  ;;  %v993_v56 = vadd.f32 %v3485_v46, %v3935_v43 }
 0x144   : > { %v984_v50 = vpop.f32.mrf.mxu0 }
 0x145   : > { %v1105_v51 = vpack.c.bf16 %v1068_v48, %v1067_v47  ;;  %v985_v54 = vadd.f32 %v3935_v43, %v984_v50  ;;  %v1073_v63 = vmax.f32 %v993_v56, 0.0 }
 0x146   : > { %v3486_v53 = vpop.f32.mrf.mxu0 }
 0x147   : > { %v996_v55 = vadd.f32 %v3486_v53, %v3935_v43  ;;  %3551 = vmatprep.mubr.msk.bf16.mxu1 %vm1150_vm2, %v1105_v51  ;;  %v1071_v61 = vmax.f32 %v985_v54, 0.0 }
 0x148   : > { %v987_v57 = vpop.f32.mrf.mxu0  ;;  %3552 = vmatmul.mubr.msk.bf16.gmra.mxu1 %vm1150_vm2, %v1106_v52 }
 0x149   : > { %v988_v58 = vadd.f32 %v3935_v43, %v987_v57  ;;  %v1074_v59 = vmax.f32 %v996_v55, 0.0 }
 0x14a   : > { %v3489_v60 = vpop.f32.mrf.mxu0 }
 0x14b   : > { %v1072_v62 = vmax.f32 %v988_v58, 0.0  ;;  %v1108_v2 = vpack.c.bf16 %v1074_v59, %v1073_v63  ;;  %v1009_v6 = vadd.f32 %v3489_v60, %v3935_v43 }
 0x14c   : > { %v1000_v0 = vpop.f32.mrf.mxu0 }
 0x14d   : > { %v1107_v1 = vpack.c.bf16 %v1072_v62, %v1071_v61  ;;  %v1001_v4 = vadd.f32 %v3935_v43, %v1000_v0  ;;  %v1077_v12 = vmax.f32 %v1009_v6, 0.0 }
 0x14e   : > { %v3490_v3 = vpop.f32.mrf.mxu0 }
 0x14f   : > { %v1012_v5 = vadd.f32 %v3490_v3, %v3935_v43  ;;  %3555 = vmatprep.mubr.msk.bf16.mxu1 %vm1150_vm2, %v1107_v1  ;;  %v1075_v10 = vmax.f32 %v1001_v4, 0.0 }
 0x150   : > { %v1003_v7 = vpop.f32.mrf.mxu0  ;;  %3556 = vmatmul.mubr.msk.bf16.gmra.mxu1 %vm1150_vm2, %v1108_v2 }
 0x151   : > { %v1004_v8 = vadd.f32 %v3935_v43, %v1003_v7  ;;  %v1078_v9 = vmax.f32 %v1012_v5, 0.0  ;;  %v3757_v43 = vld [vmem:[%s4665_s7 + $0x10] sm:$0xff]  }
 0x152   : > { %3637 = vmatprep.subr.bf16.mxu1 %v3757_v43 }
 0x153   : > { %v1076_v11 = vmax.f32 %v1004_v8, 0.0  ;;  %v1110_v14 = vpack.c.bf16 %v1078_v9, %v1077_v12  ;;  %3638 = vmatpush3.bf16.msra.mxu1 %v3757_v43 }
 0x154   : > { %3639 = vmatprep.subr.bf16.mxu1 %v3758_v24 }
 0x155   : > { %v1109_v13 = vpack.c.bf16 %v1076_v11, %v1075_v10 }
 0x157   : > { %3559 = vmatprep.mubr.msk.bf16.mxu1 %vm1150_vm2, %v1109_v13  ;;  %3640 = vmatpush3.bf16.msra.mxu1 %v3758_v24 }
 0x158   : > { %3560 = vmatmul.mubr.msk.bf16.gmra.mxu1 %vm1150_vm2, %v1110_v14  ;;  %3641 = vmatprep.subr.bf16.mxu1 %v3759_v25 }
 0x15b   : > { %3642 = vmatpush3.bf16.msra.mxu1 %v3759_v25 }
 0x1a0   : > { %v3501_v16 = vpop.f32.mrf.mxu1 }
 0x1a1   : > { %v1290_v22 = vadd.f32 %v3501_v16, %v4048_v18 }
 0x1a2   : > { %v1281_v17 = vpop.f32.mrf.mxu1 }
 0x1a3   : > { %v1282_v20 = vadd.f32 %v4048_v18, %v1281_v17  ;;  %v1538_v31 = vmax.f32 %v1290_v22, 0.0 }
 0x1a4   : > { %v3502_v19 = vpop.f32.mrf.mxu1 }
 0x1a5   : > { %v1293_v21 = vadd.f32 %v3502_v19, %v4048_v18  ;;  %v1536_v29 = vmax.f32 %v1282_v20, 0.0 }
 0x1a6   : > { %v1284_v23 = vpop.f32.mrf.mxu1 }
 0x1a7   : > { %v1285_v26 = vadd.f32 %v4048_v18, %v1284_v23  ;;  %v1539_v27 = vmax.f32 %v1293_v21, 0.0 }
 0x1a8   : > { %v3505_v28 = vpop.f32.mrf.mxu1 }
 0x1a9   : > { %v1537_v30 = vmax.f32 %v1285_v26, 0.0  ;;  %v1601_v34 = vpack.c.bf16 %v1539_v27, %v1538_v31  ;;  %v1306_v38 = vadd.f32 %v3505_v28, %v4048_v18 }
 0x1aa   : > { %v1297_v32 = vpop.f32.mrf.mxu1 }
 0x1ab   : > { %v1600_v33 = vpack.c.bf16 %v1537_v30, %v1536_v29  ;;  %v1298_v36 = vadd.f32 %v4048_v18, %v1297_v32  ;;  %v1542_v46 = vmax.f32 %v1306_v38, 0.0 }
 0x1ac   : > { %v3506_v35 = vpop.f32.mrf.mxu1 }
 0x1ad   : > { %v1309_v37 = vadd.f32 %v3506_v35, %v4048_v18  ;;  %3571 = vmatprep.mubr.msk.bf16.mxu0 %vm1150_vm2, %v1600_v33  ;;  %v1540_v44 = vmax.f32 %v1298_v36, 0.0 }
 0x1ae   : > { %v1300_v39 = vpop.f32.mrf.mxu1  ;;  %3572 = vmatmul.mubr.msk.bf16.vlgmr.msra.gmra.mxu0 %vm1150_vm2, %v1601_v34 }
 0x1af   : > { %v1301_v40 = vadd.f32 %v4048_v18, %v1300_v39  ;;  %v1543_v41 = vmax.f32 %v1309_v37, 0.0 }
 0x1b0   : > { %v3509_v42 = vpop.f32.mrf.mxu1 }
 0x1b1   : > { %v1541_v45 = vmax.f32 %v1301_v40, 0.0  ;;  %v1603_v49 = vpack.c.bf16 %v1543_v41, %v1542_v46  ;;  %v1322_v53 = vadd.f32 %v3509_v42, %v4048_v18 }
 0x1b2   : > { %v1313_v47 = vpop.f32.mrf.mxu1 }
 0x1b3   : > { %v1602_v48 = vpack.c.bf16 %v1541_v45, %v1540_v44  ;;  %v1314_v51 = vadd.f32 %v4048_v18, %v1313_v47  ;;  %v1546_v60 = vmax.f32 %v1322_v53, 0.0 }
 0x1b4   : > { %v3510_v50 = vpop.f32.mrf.mxu1 }
 0x1b5   : > { %v1325_v52 = vadd.f32 %v3510_v50, %v4048_v18  ;;  %3575 = vmatprep.mubr.msk.bf16.mxu0 %vm1150_vm2, %v1602_v48  ;;  %v1544_v58 = vmax.f32 %v1314_v51, 0.0 }
 0x1b6   : > { %v1316_v54 = vpop.f32.mrf.mxu1  ;;  %3576 = vmatmul.mubr.msk.bf16.gmra.mxu0 %vm1150_vm2, %v1603_v49 }
 0x1b7   : > { %v1317_v55 = vadd.f32 %v4048_v18, %v1316_v54  ;;  %v1547_v56 = vmax.f32 %v1325_v52, 0.0 }
 0x1b8   : > { %v3513_v57 = vpop.f32.mrf.mxu1 }
 0x1b9   : > { %v1545_v59 = vmax.f32 %v1317_v55, 0.0  ;;  %v1605_v63 = vpack.c.bf16 %v1547_v56, %v1546_v60  ;;  %v1338_v3 = vadd.f32 %v3513_v57, %v4048_v18 }
 0x1ba   : > { %v1329_v61 = vpop.f32.mrf.mxu1 }
 0x1bb   : > { %v1604_v62 = vpack.c.bf16 %v1545_v59, %v1544_v58  ;;  %v1330_v1 = vadd.f32 %v4048_v18, %v1329_v61  ;;  %v1550_v10 = vmax.f32 %v1338_v3, 0.0 }
 0x1bc   : > { %v3514_v0 = vpop.f32.mrf.mxu1 }
 0x1bd   : > { %v1341_v2 = vadd.f32 %v3514_v0, %v4048_v18  ;;  %3579 = vmatprep.mubr.msk.bf16.mxu0 %vm1150_vm2, %v1604_v62  ;;  %v1548_v8 = vmax.f32 %v1330_v1, 0.0 }
 0x1be   : > { %v1332_v4 = vpop.f32.mrf.mxu1  ;;  %3580 = vmatmul.mubr.msk.bf16.gmra.mxu0 %vm1150_vm2, %v1605_v63 }
 0x1bf   : > { %v1333_v5 = vadd.f32 %v4048_v18, %v1332_v4  ;;  %v1551_v6 = vmax.f32 %v1341_v2, 0.0 }
 0x1c0   : > { %v3517_v7 = vpop.f32.mrf.mxu1 }
 0x1c1   : > { %v1549_v9 = vmax.f32 %v1333_v5, 0.0  ;;  %v1607_v13 = vpack.c.bf16 %v1551_v6, %v1550_v10  ;;  %v1354_v16 = vadd.f32 %v3517_v7, %v4048_v18 }
 0x1c2   : > { %v1345_v11 = vpop.f32.mrf.mxu1 }
 0x1c3   : > { %v1606_v12 = vpack.c.bf16 %v1549_v9, %v1548_v8  ;;  %v1346_v15 = vadd.f32 %v4048_v18, %v1345_v11  ;;  %v1554_v24 = vmax.f32 %v1354_v16, 0.0 }
 0x1c4   : > { %v3518_v14 = vpop.f32.mrf.mxu1 }
 0x1c5   : > { %v1357_v43 = vadd.f32 %v3518_v14, %v4048_v18  ;;  %3583 = vmatprep.mubr.msk.bf16.mxu0 %vm1150_vm2, %v1606_v12  ;;  %v1552_v22 = vmax.f32 %v1346_v15, 0.0 }
 0x1c6   : > { %v1348_v17 = vpop.f32.mrf.mxu1  ;;  %3584 = vmatmul.mubr.msk.bf16.gmra.mxu0 %vm1150_vm2, %v1607_v13 }
 0x1c7   : > { %v1349_v19 = vadd.f32 %v4048_v18, %v1348_v17  ;;  %v1555_v20 = vmax.f32 %v1357_v43, 0.0 }
 0x1c8   : > { %v3521_v21 = vpop.f32.mrf.mxu1 }
 0x1c9   : > { %v1553_v23 = vmax.f32 %v1349_v19, 0.0  ;;  %v1609_v27 = vpack.c.bf16 %v1555_v20, %v1554_v24  ;;  %v1370_v31 = vadd.f32 %v3521_v21, %v4048_v18 }
 0x1ca   : > { %v1361_v25 = vpop.f32.mrf.mxu1 }
 0x1cb   : > { %v1608_v26 = vpack.c.bf16 %v1553_v23, %v1552_v22  ;;  %v1362_v29 = vadd.f32 %v4048_v18, %v1361_v25  ;;  %v1558_v38 = vmax.f32 %v1370_v31, 0.0 }
 0x1cc   : > { %v3522_v28 = vpop.f32.mrf.mxu1 }
 0x1cd   : > { %v1373_v30 = vadd.f32 %v3522_v28, %v4048_v18  ;;  %3587 = vmatprep.mubr.msk.bf16.mxu0 %vm1150_vm2, %v1608_v26  ;;  %v1556_v36 = vmax.f32 %v1362_v29, 0.0 }
 0x1ce   : > { %v1364_v32 = vpop.f32.mrf.mxu1  ;;  %3588 = vmatmul.mubr.msk.bf16.gmra.mxu0 %vm1150_vm2, %v1609_v27 }
 0x1cf   : > { %v1365_v33 = vadd.f32 %v4048_v18, %v1364_v32  ;;  %v1559_v34 = vmax.f32 %v1373_v30, 0.0 }
 0x1d0   : > { %v3525_v35 = vpop.f32.mrf.mxu1 }
 0x1d1   : > { %v1557_v37 = vmax.f32 %v1365_v33, 0.0  ;;  %v1611_v41 = vpack.c.bf16 %v1559_v34, %v1558_v38  ;;  %v1386_v46 = vadd.f32 %v3525_v35, %v4048_v18 }
 0x1d2   : > { %v1377_v39 = vpop.f32.mrf.mxu1 }
 0x1d3   : > { %v1610_v40 = vpack.c.bf16 %v1557_v37, %v1556_v36  ;;  %v1378_v44 = vadd.f32 %v4048_v18, %v1377_v39  ;;  %v1562_v53 = vmax.f32 %v1386_v46, 0.0 }
 0x1d4   : > { %v3526_v42 = vpop.f32.mrf.mxu1 }
 0x1d5   : > { %v1389_v45 = vadd.f32 %v3526_v42, %v4048_v18  ;;  %3591 = vmatprep.mubr.msk.bf16.mxu0 %vm1150_vm2, %v1610_v40  ;;  %v1560_v51 = vmax.f32 %v1378_v44, 0.0 }
 0x1d6   : > { %v1380_v47 = vpop.f32.mrf.mxu1  ;;  %3592 = vmatmul.mubr.msk.bf16.gmra.mxu0 %vm1150_vm2, %v1611_v41 }
 0x1d7   : > { %v1381_v48 = vadd.f32 %v4048_v18, %v1380_v47  ;;  %v1563_v49 = vmax.f32 %v1389_v45, 0.0 }
 0x1d8   : > { %v3529_v50 = vpop.f32.mrf.mxu1 }
 0x1d9   : > { %v1561_v52 = vmax.f32 %v1381_v48, 0.0  ;;  %v1613_v56 = vpack.c.bf16 %v1563_v49, %v1562_v53  ;;  %v1402_v60 = vadd.f32 %v3529_v50, %v4048_v18 }
 0x1da   : > { %v1393_v54 = vpop.f32.mrf.mxu1 }
 0x1db   : > { %v1612_v55 = vpack.c.bf16 %v1561_v52, %v1560_v51  ;;  %v1394_v58 = vadd.f32 %v4048_v18, %v1393_v54  ;;  %v1566_v3 = vmax.f32 %v1402_v60, 0.0 }
 0x1dc   : > { %v3530_v57 = vpop.f32.mrf.mxu1 }
 0x1dd   : > { %v1405_v59 = vadd.f32 %v3530_v57, %v4048_v18  ;;  %3595 = vmatprep.mubr.msk.bf16.mxu0 %vm1150_vm2, %v1612_v55  ;;  %v1564_v1 = vmax.f32 %v1394_v58, 0.0 }
 0x1de   : > { %v1396_v61 = vpop.f32.mrf.mxu1  ;;  %3596 = vmatmul.mubr.msk.bf16.gmra.mxu0 %vm1150_vm2, %v1613_v56 }
 0x1df   : > { %v1397_v62 = vadd.f32 %v4048_v18, %v1396_v61  ;;  %v1567_v63 = vmax.f32 %v1405_v59, 0.0 }
 0x1e0   : > { %v3533_v0 = vpop.f32.mrf.mxu1 }
 0x1e1   : > { %v1565_v2 = vmax.f32 %v1397_v62, 0.0  ;;  %v1615_v6 = vpack.c.bf16 %v1567_v63, %v1566_v3  ;;  %v1418_v10 = vadd.f32 %v3533_v0, %v4048_v18 }
 0x1e2   : > { %v1409_v4 = vpop.f32.mrf.mxu1 }
 0x1e3   : > { %v1614_v5 = vpack.c.bf16 %v1565_v2, %v1564_v1  ;;  %v1410_v8 = vadd.f32 %v4048_v18, %v1409_v4  ;;  %v1570_v16 = vmax.f32 %v1418_v10, 0.0 }
 0x1e4   : > { %v3534_v7 = vpop.f32.mrf.mxu1 }
 0x1e5   : > { %v1421_v9 = vadd.f32 %v3534_v7, %v4048_v18  ;;  %3599 = vmatprep.mubr.msk.bf16.mxu0 %vm1150_vm2, %v1614_v5  ;;  %v1568_v15 = vmax.f32 %v1410_v8, 0.0 }
 0x1e6   : > { %v1412_v11 = vpop.f32.mrf.mxu1  ;;  %3600 = vmatmul.mubr.msk.bf16.gmra.mxu0 %vm1150_vm2, %v1615_v6 }
 0x1e7   : > { %v1413_v12 = vadd.f32 %v4048_v18, %v1412_v11  ;;  %v1571_v13 = vmax.f32 %v1421_v9, 0.0 }
 0x1e8   : > { %v3537_v14 = vpop.f32.mrf.mxu1 }
 0x1e9   : > { %v1569_v43 = vmax.f32 %v1413_v12, 0.0  ;;  %v1617_v20 = vpack.c.bf16 %v1571_v13, %v1570_v16  ;;  %v1434_v24 = vadd.f32 %v3537_v14, %v4048_v18 }
 0x1ea   : > { %v1425_v17 = vpop.f32.mrf.mxu1 }
 0x1eb   : > { %v1616_v19 = vpack.c.bf16 %v1569_v43, %v1568_v15  ;;  %v1426_v22 = vadd.f32 %v4048_v18, %v1425_v17  ;;  %v1574_v31 = vmax.f32 %v1434_v24, 0.0 }
 0x1ec   : > { %v3538_v21 = vpop.f32.mrf.mxu1 }
 0x1ed   : > { %v1437_v23 = vadd.f32 %v3538_v21, %v4048_v18  ;;  %3603 = vmatprep.mubr.msk.bf16.mxu0 %vm1150_vm2, %v1616_v19  ;;  %v1572_v29 = vmax.f32 %v1426_v22, 0.0 }
 0x1ee   : > { %v1428_v25 = vpop.f32.mrf.mxu1  ;;  %3604 = vmatmul.mubr.msk.bf16.gmra.mxu0 %vm1150_vm2, %v1617_v20 }
 0x1ef   : > { %v1429_v26 = vadd.f32 %v4048_v18, %v1428_v25  ;;  %v1575_v27 = vmax.f32 %v1437_v23, 0.0 }
 0x1f0   : > { %v3541_v28 = vpop.f32.mrf.mxu1 }
 0x1f1   : > { %v1573_v30 = vmax.f32 %v1429_v26, 0.0  ;;  %v1619_v34 = vpack.c.bf16 %v1575_v27, %v1574_v31  ;;  %v1450_v38 = vadd.f32 %v3541_v28, %v4048_v18 }
 0x1f2   : > { %v1441_v32 = vpop.f32.mrf.mxu1 }
 0x1f3   : > { %v1618_v33 = vpack.c.bf16 %v1573_v30, %v1572_v29  ;;  %v1442_v36 = vadd.f32 %v4048_v18, %v1441_v32  ;;  %v1578_v46 = vmax.f32 %v1450_v38, 0.0 }
 0x1f4   : > { %v3542_v35 = vpop.f32.mrf.mxu1 }
 0x1f5   : > { %v1453_v37 = vadd.f32 %v3542_v35, %v4048_v18  ;;  %3607 = vmatprep.mubr.msk.bf16.mxu0 %vm1150_vm2, %v1618_v33  ;;  %v1576_v44 = vmax.f32 %v1442_v36, 0.0 }
 0x1f6   : > { %v1444_v39 = vpop.f32.mrf.mxu1  ;;  %3608 = vmatmul.mubr.msk.bf16.gmra.mxu0 %vm1150_vm2, %v1619_v34 }
 0x1f7   : > { %v1445_v40 = vadd.f32 %v4048_v18, %v1444_v39  ;;  %v1579_v41 = vmax.f32 %v1453_v37, 0.0 }
 0x1f8   : > { %v3545_v42 = vpop.f32.mrf.mxu1 }
 0x1f9   : > { %v1577_v45 = vmax.f32 %v1445_v40, 0.0  ;;  %v1621_v49 = vpack.c.bf16 %v1579_v41, %v1578_v46  ;;  %v1466_v53 = vadd.f32 %v3545_v42, %v4048_v18 }
 0x1fa   : > { %v1457_v47 = vpop.f32.mrf.mxu1 }
 0x1fb   : > { %v1620_v48 = vpack.c.bf16 %v1577_v45, %v1576_v44  ;;  %v1458_v51 = vadd.f32 %v4048_v18, %v1457_v47  ;;  %v1582_v60 = vmax.f32 %v1466_v53, 0.0 }
 0x1fc   : > { %v3546_v50 = vpop.f32.mrf.mxu1 }
 0x1fd   : > { %v1469_v52 = vadd.f32 %v3546_v50, %v4048_v18  ;;  %3611 = vmatprep.mubr.msk.bf16.mxu0 %vm1150_vm2, %v1620_v48  ;;  %v1580_v58 = vmax.f32 %v1458_v51, 0.0 }
 0x1fe   : > { %v1460_v54 = vpop.f32.mrf.mxu1  ;;  %3612 = vmatmul.mubr.msk.bf16.gmra.mxu0 %vm1150_vm2, %v1621_v49 }
 0x1ff   : > { %v1461_v55 = vadd.f32 %v4048_v18, %v1460_v54  ;;  %v1583_v56 = vmax.f32 %v1469_v52, 0.0 }
 0x200   : > { %v3549_v57 = vpop.f32.mrf.mxu1 }
 0x201   : > { %v1581_v59 = vmax.f32 %v1461_v55, 0.0  ;;  %v1623_v63 = vpack.c.bf16 %v1583_v56, %v1582_v60  ;;  %v1482_v3 = vadd.f32 %v3549_v57, %v4048_v18  ;;  %v4155_v57 = vld [vmem:[%s4664_s6] ss:$0 sm:$0xff] }
 0x202   : > { %v1473_v61 = vpop.f32.mrf.mxu1 }
 0x203   : > { %v1622_v62 = vpack.c.bf16 %v1581_v59, %v1580_v58  ;;  %v1474_v1 = vadd.f32 %v4048_v18, %v1473_v61  ;;  %v1586_v10 = vmax.f32 %v1482_v3, 0.0 }
 0x204   : > { %v3550_v0 = vpop.f32.mrf.mxu1 }
 0x205   : > { %v1485_v2 = vadd.f32 %v3550_v0, %v4048_v18  ;;  %3615 = vmatprep.mubr.msk.bf16.mxu0 %vm1150_vm2, %v1622_v62  ;;  %v1584_v8 = vmax.f32 %v1474_v1, 0.0 }
 0x206   : > { %v1476_v4 = vpop.f32.mrf.mxu1  ;;  %3616 = vmatmul.mubr.msk.bf16.gmra.mxu0 %vm1150_vm2, %v1623_v63 }
 0x207   : > { %v1477_v5 = vadd.f32 %v4048_v18, %v1476_v4  ;;  %v1587_v6 = vmax.f32 %v1485_v2, 0.0 }
 0x208   : > { %v3553_v7 = vpop.f32.mrf.mxu1 }
 0x209   : > { %v1585_v9 = vmax.f32 %v1477_v5, 0.0  ;;  %v1625_v13 = vpack.c.bf16 %v1587_v6, %v1586_v10  ;;  %v1498_v16 = vadd.f32 %v3553_v7, %v4048_v18 }
 0x20a   : > { %v1489_v11 = vpop.f32.mrf.mxu1 }
 0x20b   : > { %v1624_v12 = vpack.c.bf16 %v1585_v9, %v1584_v8  ;;  %v1490_v15 = vadd.f32 %v4048_v18, %v1489_v11  ;;  %v1590_v24 = vmax.f32 %v1498_v16, 0.0 }
 0x20c   : > { %v3554_v14 = vpop.f32.mrf.mxu1 }
 0x20d   : > { %v1501_v43 = vadd.f32 %v3554_v14, %v4048_v18  ;;  %3619 = vmatprep.mubr.msk.bf16.mxu0 %vm1150_vm2, %v1624_v12  ;;  %v1588_v22 = vmax.f32 %v1490_v15, 0.0 }
 0x20e   : > { %v1492_v17 = vpop.f32.mrf.mxu1  ;;  %3620 = vmatmul.mubr.msk.bf16.gmra.mxu0 %vm1150_vm2, %v1625_v13 }
 0x20f   : > { %v1493_v19 = vadd.f32 %v4048_v18, %v1492_v17  ;;  %v1591_v20 = vmax.f32 %v1501_v43, 0.0 }
 0x210   : > { %v3557_v21 = vpop.f32.mrf.mxu1 }
 0x211   : > { %v1589_v23 = vmax.f32 %v1493_v19, 0.0  ;;  %v1627_v27 = vpack.c.bf16 %v1591_v20, %v1590_v24  ;;  %v1514_v31 = vadd.f32 %v3557_v21, %v4048_v18 }
 0x212   : > { %v1505_v25 = vpop.f32.mrf.mxu1 }
 0x213   : > { %v1626_v26 = vpack.c.bf16 %v1589_v23, %v1588_v22  ;;  %v1506_v29 = vadd.f32 %v4048_v18, %v1505_v25  ;;  %v1594_v38 = vmax.f32 %v1514_v31, 0.0 }
 0x214   : > { %v3558_v28 = vpop.f32.mrf.mxu1 }
 0x215   : > { %v1517_v30 = vadd.f32 %v3558_v28, %v4048_v18  ;;  %3623 = vmatprep.mubr.msk.bf16.mxu0 %vm1150_vm2, %v1626_v26  ;;  %v1592_v36 = vmax.f32 %v1506_v29, 0.0 }
 0x216   : > { %v1508_v32 = vpop.f32.mrf.mxu1  ;;  %3624 = vmatmul.mubr.msk.bf16.gmra.mxu0 %vm1150_vm2, %v1627_v27 }
 0x217   : > { %v1509_v33 = vadd.f32 %v4048_v18, %v1508_v32  ;;  %v1595_v34 = vmax.f32 %v1517_v30, 0.0 }
 0x218   : > { %v3561_v35 = vpop.f32.mrf.mxu1 }
 0x219   : > { %v1593_v37 = vmax.f32 %v1509_v33, 0.0  ;;  %v1629_v41 = vpack.c.bf16 %v1595_v34, %v1594_v38  ;;  %v1530_v46 = vadd.f32 %v3561_v35, %v4048_v18 }
 0x21a   : > { %v1521_v39 = vpop.f32.mrf.mxu1 }
 0x21b   : > { %v1628_v40 = vpack.c.bf16 %v1593_v37, %v1592_v36  ;;  %v1522_v44 = vadd.f32 %v4048_v18, %v1521_v39  ;;  %v1598_v52 = vmax.f32 %v1530_v46, 0.0 }
 0x21c   : > { %v3562_v42 = vpop.f32.mrf.mxu1 }
 0x21d   : > { %v1533_v45 = vadd.f32 %v3562_v42, %v4048_v18  ;;  %3627 = vmatprep.mubr.msk.bf16.mxu0 %vm1150_vm2, %v1628_v40  ;;  %v1596_v50 = vmax.f32 %v1522_v44, 0.0 }
 0x21e   : > { %v1524_v47 = vpop.f32.mrf.mxu1  ;;  %3628 = vmatmul.mubr.msk.bf16.gmra.mxu0 %vm1150_vm2, %v1629_v41 }
 0x21f   : > { %v1525_v48 = vadd.f32 %v4048_v18, %v1524_v47  ;;  %v1599_v49 = vmax.f32 %v1533_v45, 0.0 }
 0x221   : > { %v1597_v51 = vmax.f32 %v1525_v48, 0.0  ;;  %v1631_v54 = vpack.c.bf16 %v1599_v49, %v1598_v52 }
 0x223   : > { %v1630_v53 = vpack.c.bf16 %v1597_v51, %v1596_v50 }
 0x225   : > { %3631 = vmatprep.mubr.msk.bf16.mxu0 %vm1150_vm2, %v1630_v53 }
 0x226   : > { %3632 = vmatmul.mubr.msk.bf16.gmra.mxu0 %vm1150_vm2, %v1631_v54 }
 0x26e   : > { %v3573_v55 = vpop.f32.mrf.mxu0 }
 0x26f   : > { %v1810_v60 = vadd.f32 %v3573_v55, %v4155_v57 }
 0x270   : > { %v1801_v56 = vpop.f32.mrf.mxu0 }
 0x271   : > { %v1802_v18 = vadd.f32 %v4155_v57, %v1801_v56  ;;  %v2058_v3 = vmax.f32 %v1810_v60, 0.0 }
 0x272   : > { %v3574_v58 = vpop.f32.mrf.mxu0 }
 0x273   : > { %v1813_v59 = vadd.f32 %v3574_v58, %v4155_v57  ;;  %v2056_v1 = vmax.f32 %v1802_v18, 0.0 }
 0x274   : > { %v1804_v61 = vpop.f32.mrf.mxu0 }
 0x275   : > { %v1805_v62 = vadd.f32 %v4155_v57, %v1804_v61  ;;  %v2059_v63 = vmax.f32 %v1813_v59, 0.0 }
 0x276   : > { %v3577_v0 = vpop.f32.mrf.mxu0 }
 0x277   : > { %v2057_v2 = vmax.f32 %v1805_v62, 0.0  ;;  %v2121_v6 = vpack.c.bf16 %v2059_v63, %v2058_v3  ;;  %v1826_v10 = vadd.f32 %v3577_v0, %v4155_v57 }
 0x278   : > { %v1817_v4 = vpop.f32.mrf.mxu0 }
 0x279   : > { %v2120_v5 = vpack.c.bf16 %v2057_v2, %v2056_v1  ;;  %v1818_v8 = vadd.f32 %v4155_v57, %v1817_v4  ;;  %v2062_v16 = vmax.f32 %v1826_v10, 0.0 }
 0x27a   : > { %v3578_v7 = vpop.f32.mrf.mxu0 }
 0x27b   : > { %v1829_v9 = vadd.f32 %v3578_v7, %v4155_v57  ;;  %3643 = vmatprep.mubr.msk.bf16.mxu1 %vm1150_vm2, %v2120_v5  ;;  %v2060_v15 = vmax.f32 %v1818_v8, 0.0 }
 0x27c   : > { %v1820_v11 = vpop.f32.mrf.mxu0  ;;  %3644 = vmatmul.mubr.msk.bf16.vlgmr.msra.gmra.mxu1 %vm1150_vm2, %v2121_v6 }
 0x27d   : > { %v1821_v12 = vadd.f32 %v4155_v57, %v1820_v11  ;;  %v2063_v13 = vmax.f32 %v1829_v9, 0.0 }
 0x27e   : > { %v3581_v14 = vpop.f32.mrf.mxu0 }
 0x27f   : > { %v2061_v43 = vmax.f32 %v1821_v12, 0.0  ;;  %v2123_v20 = vpack.c.bf16 %v2063_v13, %v2062_v16  ;;  %v1842_v24 = vadd.f32 %v3581_v14, %v4155_v57 }
 0x280   : > { %v1833_v17 = vpop.f32.mrf.mxu0 }
 0x281   : > { %v2122_v19 = vpack.c.bf16 %v2061_v43, %v2060_v15  ;;  %v1834_v22 = vadd.f32 %v4155_v57, %v1833_v17  ;;  %v2066_v31 = vmax.f32 %v1842_v24, 0.0 }
 0x282   : > { %v3582_v21 = vpop.f32.mrf.mxu0 }
 0x283   : > { %v1845_v23 = vadd.f32 %v3582_v21, %v4155_v57  ;;  %3647 = vmatprep.mubr.msk.bf16.mxu1 %vm1150_vm2, %v2122_v19  ;;  %v2064_v29 = vmax.f32 %v1834_v22, 0.0 }
 0x284   : > { %v1836_v25 = vpop.f32.mrf.mxu0  ;;  %3648 = vmatmul.mubr.msk.bf16.gmra.mxu1 %vm1150_vm2, %v2123_v20 }
 0x285   : > { %v1837_v26 = vadd.f32 %v4155_v57, %v1836_v25  ;;  %v2067_v27 = vmax.f32 %v1845_v23, 0.0 }
 0x286   : > { %v3585_v28 = vpop.f32.mrf.mxu0 }
 0x287   : > { %v2065_v30 = vmax.f32 %v1837_v26, 0.0  ;;  %v2125_v34 = vpack.c.bf16 %v2067_v27, %v2066_v31  ;;  %v1858_v38 = vadd.f32 %v3585_v28, %v4155_v57 }
 0x288   : > { %v1849_v32 = vpop.f32.mrf.mxu0 }
 0x289   : > { %v2124_v33 = vpack.c.bf16 %v2065_v30, %v2064_v29  ;;  %v1850_v36 = vadd.f32 %v4155_v57, %v1849_v32  ;;  %v2070_v46 = vmax.f32 %v1858_v38, 0.0 }
 0x28a   : > { %v3586_v35 = vpop.f32.mrf.mxu0 }
 0x28b   : > { %v1861_v37 = vadd.f32 %v3586_v35, %v4155_v57  ;;  %3651 = vmatprep.mubr.msk.bf16.mxu1 %vm1150_vm2, %v2124_v33  ;;  %v2068_v44 = vmax.f32 %v1850_v36, 0.0 }
 0x28c   : > { %v1852_v39 = vpop.f32.mrf.mxu0  ;;  %3652 = vmatmul.mubr.msk.bf16.gmra.mxu1 %vm1150_vm2, %v2125_v34 }
 0x28d   : > { %v1853_v40 = vadd.f32 %v4155_v57, %v1852_v39  ;;  %v2071_v41 = vmax.f32 %v1861_v37, 0.0 }
 0x28e   : > { %v3589_v42 = vpop.f32.mrf.mxu0 }
 0x28f   : > { %v2069_v45 = vmax.f32 %v1853_v40, 0.0  ;;  %v2127_v49 = vpack.c.bf16 %v2071_v41, %v2070_v46  ;;  %v1874_v53 = vadd.f32 %v3589_v42, %v4155_v57 }
 0x290   : > { %v1865_v47 = vpop.f32.mrf.mxu0 }
 0x291   : > { %v2126_v48 = vpack.c.bf16 %v2069_v45, %v2068_v44  ;;  %v1866_v51 = vadd.f32 %v4155_v57, %v1865_v47  ;;  %v2074_v60 = vmax.f32 %v1874_v53, 0.0 }
 0x292   : > { %v3590_v50 = vpop.f32.mrf.mxu0 }
 0x293   : > { %v1877_v52 = vadd.f32 %v3590_v50, %v4155_v57  ;;  %3655 = vmatprep.mubr.msk.bf16.mxu1 %vm1150_vm2, %v2126_v48  ;;  %v2072_v18 = vmax.f32 %v1866_v51, 0.0 }
 0x294   : > { %v1868_v54 = vpop.f32.mrf.mxu0  ;;  %3656 = vmatmul.mubr.msk.bf16.gmra.mxu1 %vm1150_vm2, %v2127_v49 }
 0x295   : > { %v1869_v55 = vadd.f32 %v4155_v57, %v1868_v54  ;;  %v2075_v56 = vmax.f32 %v1877_v52, 0.0 }
 0x296   : > { %v3593_v58 = vpop.f32.mrf.mxu0 }
 0x297   : > { %v2073_v59 = vmax.f32 %v1869_v55, 0.0  ;;  %v2129_v63 = vpack.c.bf16 %v2075_v56, %v2074_v60  ;;  %v1890_v3 = vadd.f32 %v3593_v58, %v4155_v57 }
 0x298   : > { %v1881_v61 = vpop.f32.mrf.mxu0 }
 0x299   : > { %v2128_v62 = vpack.c.bf16 %v2073_v59, %v2072_v18  ;;  %v1882_v1 = vadd.f32 %v4155_v57, %v1881_v61  ;;  %v2078_v10 = vmax.f32 %v1890_v3, 0.0 }
 0x29a   : > { %v3594_v0 = vpop.f32.mrf.mxu0 }
 0x29b   : > { %v1893_v2 = vadd.f32 %v3594_v0, %v4155_v57  ;;  %3659 = vmatprep.mubr.msk.bf16.mxu1 %vm1150_vm2, %v2128_v62  ;;  %v2076_v8 = vmax.f32 %v1882_v1, 0.0 }
 0x29c   : > { %v1884_v4 = vpop.f32.mrf.mxu0  ;;  %3660 = vmatmul.mubr.msk.bf16.gmra.mxu1 %vm1150_vm2, %v2129_v63 }
 0x29d   : > { %v1885_v5 = vadd.f32 %v4155_v57, %v1884_v4  ;;  %v2079_v6 = vmax.f32 %v1893_v2, 0.0 }
 0x29e   : > { %v3597_v7 = vpop.f32.mrf.mxu0 }
 0x29f   : > { %v2077_v9 = vmax.f32 %v1885_v5, 0.0  ;;  %v2131_v13 = vpack.c.bf16 %v2079_v6, %v2078_v10  ;;  %v1906_v16 = vadd.f32 %v3597_v7, %v4155_v57 }
 0x2a0   : > { %v1897_v11 = vpop.f32.mrf.mxu0 }
 0x2a1   : > { %v2130_v12 = vpack.c.bf16 %v2077_v9, %v2076_v8  ;;  %v1898_v15 = vadd.f32 %v4155_v57, %v1897_v11  ;;  %v2082_v24 = vmax.f32 %v1906_v16, 0.0 }
 0x2a2   : > { %v3598_v14 = vpop.f32.mrf.mxu0 }
 0x2a3   : > { %v1909_v43 = vadd.f32 %v3598_v14, %v4155_v57  ;;  %3663 = vmatprep.mubr.msk.bf16.mxu1 %vm1150_vm2, %v2130_v12  ;;  %v2080_v22 = vmax.f32 %v1898_v15, 0.0 }
 0x2a4   : > { %v1900_v17 = vpop.f32.mrf.mxu0  ;;  %3664 = vmatmul.mubr.msk.bf16.gmra.mxu1 %vm1150_vm2, %v2131_v13 }
 0x2a5   : > { %v1901_v19 = vadd.f32 %v4155_v57, %v1900_v17  ;;  %v2083_v20 = vmax.f32 %v1909_v43, 0.0 }
 0x2a6   : > { %v3601_v21 = vpop.f32.mrf.mxu0 }
 0x2a7   : > { %v2081_v23 = vmax.f32 %v1901_v19, 0.0  ;;  %v2133_v27 = vpack.c.bf16 %v2083_v20, %v2082_v24  ;;  %v1922_v31 = vadd.f32 %v3601_v21, %v4155_v57 }
 0x2a8   : > { %v1913_v25 = vpop.f32.mrf.mxu0 }
 0x2a9   : > { %v2132_v26 = vpack.c.bf16 %v2081_v23, %v2080_v22  ;;  %v1914_v29 = vadd.f32 %v4155_v57, %v1913_v25  ;;  %v2086_v38 = vmax.f32 %v1922_v31, 0.0 }
 0x2aa   : > { %v3602_v28 = vpop.f32.mrf.mxu0 }
 0x2ab   : > { %v1925_v30 = vadd.f32 %v3602_v28, %v4155_v57  ;;  %3667 = vmatprep.mubr.msk.bf16.mxu1 %vm1150_vm2, %v2132_v26  ;;  %v2084_v36 = vmax.f32 %v1914_v29, 0.0 }
 0x2ac   : > { %v1916_v32 = vpop.f32.mrf.mxu0  ;;  %3668 = vmatmul.mubr.msk.bf16.gmra.mxu1 %vm1150_vm2, %v2133_v27 }
 0x2ad   : > { %v1917_v33 = vadd.f32 %v4155_v57, %v1916_v32  ;;  %v2087_v34 = vmax.f32 %v1925_v30, 0.0 }
 0x2ae   : > { %v3605_v35 = vpop.f32.mrf.mxu0 }
 0x2af   : > { %v2085_v37 = vmax.f32 %v1917_v33, 0.0  ;;  %v2135_v41 = vpack.c.bf16 %v2087_v34, %v2086_v38  ;;  %v1938_v46 = vadd.f32 %v3605_v35, %v4155_v57 }
 0x2b0   : > { %v1929_v39 = vpop.f32.mrf.mxu0 }
 0x2b1   : > { %v2134_v40 = vpack.c.bf16 %v2085_v37, %v2084_v36  ;;  %v1930_v44 = vadd.f32 %v4155_v57, %v1929_v39  ;;  %v2090_v53 = vmax.f32 %v1938_v46, 0.0 }
 0x2b2   : > { %v3606_v42 = vpop.f32.mrf.mxu0 }
 0x2b3   : > { %v1941_v45 = vadd.f32 %v3606_v42, %v4155_v57  ;;  %3671 = vmatprep.mubr.msk.bf16.mxu1 %vm1150_vm2, %v2134_v40  ;;  %v2088_v51 = vmax.f32 %v1930_v44, 0.0 }
 0x2b4   : > { %v1932_v47 = vpop.f32.mrf.mxu0  ;;  %3672 = vmatmul.mubr.msk.bf16.gmra.mxu1 %vm1150_vm2, %v2135_v41 }
 0x2b5   : > { %v1933_v48 = vadd.f32 %v4155_v57, %v1932_v47  ;;  %v2091_v49 = vmax.f32 %v1941_v45, 0.0 }
 0x2b6   : > { %v3609_v50 = vpop.f32.mrf.mxu0 }
 0x2b7   : > { %v2089_v52 = vmax.f32 %v1933_v48, 0.0  ;;  %v2137_v56 = vpack.c.bf16 %v2091_v49, %v2090_v53  ;;  %v1954_v60 = vadd.f32 %v3609_v50, %v4155_v57 }
 0x2b8   : > { %v1945_v54 = vpop.f32.mrf.mxu0 }
 0x2b9   : > { %v2136_v55 = vpack.c.bf16 %v2089_v52, %v2088_v51  ;;  %v1946_v18 = vadd.f32 %v4155_v57, %v1945_v54  ;;  %v2094_v3 = vmax.f32 %v1954_v60, 0.0 }
 0x2ba   : > { %v3610_v58 = vpop.f32.mrf.mxu0 }
 0x2bb   : > { %v1957_v59 = vadd.f32 %v3610_v58, %v4155_v57  ;;  %3675 = vmatprep.mubr.msk.bf16.mxu1 %vm1150_vm2, %v2136_v55  ;;  %v2092_v1 = vmax.f32 %v1946_v18, 0.0 }
 0x2bc   : > { %v1948_v61 = vpop.f32.mrf.mxu0  ;;  %3676 = vmatmul.mubr.msk.bf16.gmra.mxu1 %vm1150_vm2, %v2137_v56 }
 0x2bd   : > { %v1949_v62 = vadd.f32 %v4155_v57, %v1948_v61  ;;  %v2095_v63 = vmax.f32 %v1957_v59, 0.0 }
 0x2be   : > { %v3613_v0 = vpop.f32.mrf.mxu0 }
 0x2bf   : > { %v2093_v2 = vmax.f32 %v1949_v62, 0.0  ;;  %v2139_v6 = vpack.c.bf16 %v2095_v63, %v2094_v3  ;;  %v1970_v10 = vadd.f32 %v3613_v0, %v4155_v57 }
 0x2c0   : > { %v1961_v4 = vpop.f32.mrf.mxu0 }
 0x2c1   : > { %v2138_v5 = vpack.c.bf16 %v2093_v2, %v2092_v1  ;;  %v1962_v8 = vadd.f32 %v4155_v57, %v1961_v4  ;;  %v2098_v16 = vmax.f32 %v1970_v10, 0.0 }
 0x2c2   : > { %v3614_v7 = vpop.f32.mrf.mxu0 }
 0x2c3   : > { %v1973_v9 = vadd.f32 %v3614_v7, %v4155_v57  ;;  %3679 = vmatprep.mubr.msk.bf16.mxu1 %vm1150_vm2, %v2138_v5  ;;  %v2096_v15 = vmax.f32 %v1962_v8, 0.0 }
 0x2c4   : > { %v1964_v11 = vpop.f32.mrf.mxu0  ;;  %3680 = vmatmul.mubr.msk.bf16.gmra.mxu1 %vm1150_vm2, %v2139_v6 }
 0x2c5   : > { %v1965_v12 = vadd.f32 %v4155_v57, %v1964_v11  ;;  %v2099_v13 = vmax.f32 %v1973_v9, 0.0 }
 0x2c6   : > { %v3617_v14 = vpop.f32.mrf.mxu0 }
 0x2c7   : > { %v2097_v43 = vmax.f32 %v1965_v12, 0.0  ;;  %v2141_v20 = vpack.c.bf16 %v2099_v13, %v2098_v16  ;;  %v1986_v24 = vadd.f32 %v3617_v14, %v4155_v57 }
 0x2c8   : > { %v1977_v17 = vpop.f32.mrf.mxu0 }
 0x2c9   : > { %v2140_v19 = vpack.c.bf16 %v2097_v43, %v2096_v15  ;;  %v1978_v22 = vadd.f32 %v4155_v57, %v1977_v17  ;;  %v2102_v31 = vmax.f32 %v1986_v24, 0.0 }
 0x2ca   : > { %v3618_v21 = vpop.f32.mrf.mxu0 }
 0x2cb   : > { %v1989_v23 = vadd.f32 %v3618_v21, %v4155_v57  ;;  %3683 = vmatprep.mubr.msk.bf16.mxu1 %vm1150_vm2, %v2140_v19  ;;  %v2100_v29 = vmax.f32 %v1978_v22, 0.0 }
 0x2cc   : > { %v1980_v25 = vpop.f32.mrf.mxu0  ;;  %3684 = vmatmul.mubr.msk.bf16.gmra.mxu1 %vm1150_vm2, %v2141_v20 }
 0x2cd   : > { %v1981_v26 = vadd.f32 %v4155_v57, %v1980_v25  ;;  %v2103_v27 = vmax.f32 %v1989_v23, 0.0 }
 0x2ce   : > { %v3621_v28 = vpop.f32.mrf.mxu0 }
 0x2cf   : > { %v2101_v30 = vmax.f32 %v1981_v26, 0.0  ;;  %v2143_v34 = vpack.c.bf16 %v2103_v27, %v2102_v31  ;;  %v2002_v38 = vadd.f32 %v3621_v28, %v4155_v57  ;;  %v4256_v26 = vld [vmem:[%s4666_s8] ss:$0 sm:$0xff] }
 0x2d0   : > { %v1993_v32 = vpop.f32.mrf.mxu0 }
 0x2d1   : > { %v2142_v33 = vpack.c.bf16 %v2101_v30, %v2100_v29  ;;  %v1994_v36 = vadd.f32 %v4155_v57, %v1993_v32  ;;  %v2106_v46 = vmax.f32 %v2002_v38, 0.0 }
 0x2d2   : > { %v3622_v35 = vpop.f32.mrf.mxu0 }
 0x2d3   : > { %v2005_v37 = vadd.f32 %v3622_v35, %v4155_v57  ;;  %3687 = vmatprep.mubr.msk.bf16.mxu1 %vm1150_vm2, %v2142_v33  ;;  %v2104_v44 = vmax.f32 %v1994_v36, 0.0 }
 0x2d4   : > { %v1996_v39 = vpop.f32.mrf.mxu0  ;;  %3688 = vmatmul.mubr.msk.bf16.gmra.mxu1 %vm1150_vm2, %v2143_v34 }
 0x2d5   : > { %v1997_v40 = vadd.f32 %v4155_v57, %v1996_v39  ;;  %v2107_v41 = vmax.f32 %v2005_v37, 0.0 }
 0x2d6   : > { %v3625_v42 = vpop.f32.mrf.mxu0 }
 0x2d7   : > { %v2105_v45 = vmax.f32 %v1997_v40, 0.0  ;;  %v2145_v49 = vpack.c.bf16 %v2107_v41, %v2106_v46  ;;  %v2018_v53 = vadd.f32 %v3625_v42, %v4155_v57 }
 0x2d8   : > { %v2009_v47 = vpop.f32.mrf.mxu0 }
 0x2d9   : > { %v2144_v48 = vpack.c.bf16 %v2105_v45, %v2104_v44  ;;  %v2010_v51 = vadd.f32 %v4155_v57, %v2009_v47  ;;  %v2110_v60 = vmax.f32 %v2018_v53, 0.0 }
 0x2da   : > { %v3626_v50 = vpop.f32.mrf.mxu0 }
 0x2db   : > { %v2021_v52 = vadd.f32 %v3626_v50, %v4155_v57  ;;  %3691 = vmatprep.mubr.msk.bf16.mxu1 %vm1150_vm2, %v2144_v48  ;;  %v2108_v18 = vmax.f32 %v2010_v51, 0.0 }
 0x2dc   : > { %v2012_v54 = vpop.f32.mrf.mxu0  ;;  %3692 = vmatmul.mubr.msk.bf16.gmra.mxu1 %vm1150_vm2, %v2145_v49 }
 0x2dd   : > { %v2013_v55 = vadd.f32 %v4155_v57, %v2012_v54  ;;  %v2111_v56 = vmax.f32 %v2021_v52, 0.0 }
 0x2de   : > { %v3629_v58 = vpop.f32.mrf.mxu0 }
 0x2df   : > { %v2109_v59 = vmax.f32 %v2013_v55, 0.0  ;;  %v2147_v63 = vpack.c.bf16 %v2111_v56, %v2110_v60  ;;  %v2034_v3 = vadd.f32 %v3629_v58, %v4155_v57 }
 0x2e0   : > { %v2025_v61 = vpop.f32.mrf.mxu0 }
 0x2e1   : > { %v2146_v62 = vpack.c.bf16 %v2109_v59, %v2108_v18  ;;  %v2026_v1 = vadd.f32 %v4155_v57, %v2025_v61  ;;  %v2114_v10 = vmax.f32 %v2034_v3, 0.0 }
 0x2e2   : > { %v3630_v0 = vpop.f32.mrf.mxu0 }
 0x2e3   : > { %v2037_v2 = vadd.f32 %v3630_v0, %v4155_v57  ;;  %3695 = vmatprep.mubr.msk.bf16.mxu1 %vm1150_vm2, %v2146_v62  ;;  %v2112_v8 = vmax.f32 %v2026_v1, 0.0 }
 0x2e4   : > { %v2028_v4 = vpop.f32.mrf.mxu0  ;;  %3696 = vmatmul.mubr.msk.bf16.gmra.mxu1 %vm1150_vm2, %v2147_v63 }
 0x2e5   : > { %v2029_v5 = vadd.f32 %v4155_v57, %v2028_v4  ;;  %v2115_v6 = vmax.f32 %v2037_v2, 0.0 }
 0x2e6   : > { %v3633_v7 = vpop.f32.mrf.mxu0 }
 0x2e7   : > { %v2113_v9 = vmax.f32 %v2029_v5, 0.0  ;;  %v2149_v13 = vpack.c.bf16 %v2115_v6, %v2114_v10  ;;  %v2050_v16 = vadd.f32 %v3633_v7, %v4155_v57 }
 0x2e8   : > { %v2041_v11 = vpop.f32.mrf.mxu0 }
 0x2e9   : > { %v2148_v12 = vpack.c.bf16 %v2113_v9, %v2112_v8  ;;  %v2042_v15 = vadd.f32 %v4155_v57, %v2041_v11  ;;  %v2118_v23 = vmax.f32 %v2050_v16, 0.0 }
 0x2ea   : > { %v3634_v14 = vpop.f32.mrf.mxu0 }
 0x2eb   : > { %v2053_v43 = vadd.f32 %v3634_v14, %v4155_v57  ;;  %3699 = vmatprep.mubr.msk.bf16.mxu1 %vm1150_vm2, %v2148_v12  ;;  %v2116_v21 = vmax.f32 %v2042_v15, 0.0 }
 0x2ec   : > { %v2044_v17 = vpop.f32.mrf.mxu0  ;;  %3700 = vmatmul.mubr.msk.bf16.gmra.mxu1 %vm1150_vm2, %v2149_v13 }
 0x2ed   : > { %v2045_v19 = vadd.f32 %v4155_v57, %v2044_v17  ;;  %v2119_v20 = vmax.f32 %v2053_v43, 0.0  ;;  %v4262_v57 = vld [vmem:[%s4667_s9] ss:$0 sm:$0xff] }
 0x2ef   : > { %v2117_v22 = vmax.f32 %v2045_v19, 0.0  ;;  %v2151_v25 = vpack.c.bf16 %v2119_v20, %v2118_v23 }
 0x2f1   : > { %v2150_v24 = vpack.c.bf16 %v2117_v22, %v2116_v21 }
 0x2f3   : > { %3703 = vmatprep.mubr.msk.bf16.mxu1 %vm1150_vm2, %v2150_v24 }
 0x2f4   : > { %3704 = vmatmul.mubr.msk.bf16.gmra.mxu1 %vm1150_vm2, %v2151_v25 }
 0x33c   : > { %v3645_v27 = vpop.f32.mrf.mxu1 }
 0x33d   : > { %v2330_v28 = vadd.f32 %v3645_v27, %v4256_v26 }
 0x33e   : > { %v2321_v29 = vpop.f32.mrf.mxu1 }
 0x33f   : > { %v2578_v30 = vmax.f32 %v2330_v28, 0.0  ;;  %v2322_v31 = vadd.f32 %v4256_v26, %v2321_v29 }
 0x340   : > { %v3646_v32 = vpop.f32.mrf.mxu1 }
 0x341   : > { %v2576_v33 = vmax.f32 %v2322_v31, 0.0  ;;  %v2333_v34 = vadd.f32 %v3646_v32, %v4256_v26  ;;  %v2649_v35 = vmul.f32 %v4262_v57, %v2578_v30 }
 0x342   : > { %v2324_v36 = vpop.f32.mrf.mxu1 }
 0x343   : > { %v2579_v37 = vmax.f32 %v2333_v34, 0.0  ;;  %v2325_v38 = vadd.f32 %v4256_v26, %v2324_v36  ;;  %v2717_v39 = vsel %vm1150_vm2, %v2649_v35, 0.0  ;;  %v2647_v40 = vmul.f32 %v4262_v57, %v2576_v33 }
 0x344   : > { %2718 = vadd.xlane.f32.xlu1 %v2717_v39  ;;  %v3649_v41 = vpop.f32.mrf.mxu1 }
 0x345   : > { %v2577_v42 = vmax.f32 %v2325_v38, 0.0  ;;  %v2346_v44 = vadd.f32 %v3649_v41, %v4256_v26  ;;  %v2711_v45 = vsel %vm1150_vm2, %v2647_v40, 0.0  ;;  %v2650_v46 = vmul.f32 %v4262_v57, %v2579_v37 }
 0x346   : > { %v2337_v47 = vpop.f32.mrf.mxu1  ;;  %2712 = vadd.xlane.f32.xlu0 %v2711_v45 }
 0x347   : > { %v2582_v48 = vmax.f32 %v2346_v44, 0.0  ;;  %v2338_v49 = vadd.f32 %v4256_v26, %v2337_v47  ;;  %v2720_v50 = vsel %vm1150_vm2, %v2650_v46, 0.0  ;;  %v2648_v51 = vmul.f32 %v4262_v57, %v2577_v42 }
 0x348   : > { %2721 = vadd.xlane.f32.xlu1 %v2720_v50  ;;  %v3650_v52 = vpop.f32.mrf.mxu1 }
 0x349   : > { %v2580_v53 = vmax.f32 %v2338_v49, 0.0  ;;  %v2349_v54 = vadd.f32 %v3650_v52, %v4256_v26  ;;  %v2714_v55 = vsel %vm1150_vm2, %v2648_v51, 0.0  ;;  %v2653_v56 = vmul.f32 %v4262_v57, %v2582_v48 }
 0x34a   : > { %v2340_v58 = vpop.f32.mrf.mxu1  ;;  %2715 = vadd.xlane.f32.xlu0 %v2714_v55 }
 0x34b   : > { %v2583_v18 = vmax.f32 %v2349_v54, 0.0  ;;  %v2341_v59 = vadd.f32 %v4256_v26, %v2340_v58  ;;  %v2729_v61 = vsel %vm1150_vm2, %v2653_v56, 0.0  ;;  %v2651_v1 = vmul.f32 %v4262_v57, %v2580_v53 }
 0x34c   : > { %v3653_v60 = vpop.f32.mrf.mxu1 }
 0x34d   : > { %v2581_v62 = vmax.f32 %v2341_v59, 0.0  ;;  %v2362_v63 = vadd.f32 %v3653_v60, %v4256_v26  ;;  %v2654_v0 = vmul.f32 %v4262_v57, %v2583_v18  ;;  %v2723_v10 = vsel %vm1150_vm2, %v2651_v1, 0.0 }
 0x34e   : > { %v2353_v2 = vpop.f32.mrf.mxu1  ;;  %2730 = vadd.xlane.f32.xlu0 %v2729_v61 }
 0x34f   : > { %v2586_v3 = vmax.f32 %v2362_v63, 0.0  ;;  %v2354_v4 = vadd.f32 %v4256_v26, %v2353_v2  ;;  %v2732_v5 = vsel %vm1150_vm2, %v2654_v0, 0.0  ;;  %v2652_v6 = vmul.f32 %v4262_v57, %v2581_v62 }
 0x350   : > { %2733 = vadd.xlane.f32.xlu1 %v2732_v5  ;;  %v3654_v7 = vpop.f32.mrf.mxu1 }
 0x351   : > { %v2584_v8 = vmax.f32 %v2354_v4, 0.0  ;;  %v2365_v9 = vadd.f32 %v3654_v7, %v4256_v26  ;;  %v2657_v11 = vmul.f32 %v4262_v57, %v2586_v3  ;;  %v2726_v15 = vsel %vm1150_vm2, %v2652_v6, 0.0 }
 0x352   : > { %v2356_v12 = vpop.f32.mrf.mxu1  ;;  %2724 = vadd.xlane.f32.xlu0 %v2723_v10 }
 0x353   : > { %v2587_v13 = vmax.f32 %v2365_v9, 0.0  ;;  %v2357_v14 = vadd.f32 %v4256_v26, %v2356_v12  ;;  %v2741_v16 = vsel %vm1150_vm2, %v2657_v11, 0.0  ;;  %v2655_v21 = vmul.f32 %v4262_v57, %v2584_v8 }
 0x354   : > { %v3657_v43 = vpop.f32.mrf.mxu1  ;;  %2727 = vadd.xlane.f32.xlu1 %v2726_v15 }
 0x355   : > { %v2585_v17 = vmax.f32 %v2357_v14, 0.0  ;;  %v2378_v19 = vadd.f32 %v3657_v43, %v4256_v26  ;;  %v2658_v20 = vmul.f32 %v4262_v57, %v2587_v13  ;;  %v2735_v31 = vsel %vm1150_vm2, %v2655_v21, 0.0 }
 0x356   : > { %v2369_v22 = vpop.f32.mrf.mxu1  ;;  %2742 = vadd.xlane.f32.xlu0 %v2741_v16 }
 0x357   : > { %v2590_v23 = vmax.f32 %v2378_v19, 0.0  ;;  %v2370_v24 = vadd.f32 %v4256_v26, %v2369_v22  ;;  %v2744_v25 = vsel %vm1150_vm2, %v2658_v20, 0.0  ;;  %v2656_v27 = vmul.f32 %v4262_v57, %v2585_v17 }
 0x358   : > { %v3658_v28 = vpop.f32.mrf.mxu1  ;;  %2745 = vadd.xlane.f32.xlu1 %v2744_v25 }
 0x359   : > { %v2588_v29 = vmax.f32 %v2370_v24, 0.0  ;;  %v2381_v30 = vadd.f32 %v3658_v28, %v4256_v26  ;;  %v2661_v32 = vmul.f32 %v4262_v57, %v2590_v23  ;;  %v2738_v36 = vsel %vm1150_vm2, %v2656_v27, 0.0 }
 0x35a   : > { %v2372_v33 = vpop.f32.mrf.mxu1  ;;  %2736 = vadd.xlane.f32.xlu0 %v2735_v31 }
 0x35b   : > { %v2591_v34 = vmax.f32 %v2381_v30, 0.0  ;;  %v2373_v35 = vadd.f32 %v4256_v26, %v2372_v33  ;;  %v2753_v38 = vsel %vm1150_vm2, %v2661_v32, 0.0  ;;  %v2659_v42 = vmul.f32 %v4262_v57, %v2588_v29 }
 0x35c   : > { %v3661_v37 = vpop.f32.mrf.mxu1  ;;  %2739 = vadd.xlane.f32.xlu1 %v2738_v36 }
 0x35d   : > { %v2589_v39 = vmax.f32 %v2373_v35, 0.0  ;;  %v2394_v40 = vadd.f32 %v3661_v37, %v4256_v26  ;;  %v2662_v41 = vmul.f32 %v4262_v57, %v2591_v34  ;;  %v2747_v52 = vsel %vm1150_vm2, %v2659_v42, 0.0 }
 0x35e   : > { %v2385_v44 = vpop.f32.mrf.mxu1  ;;  %2754 = vadd.xlane.f32.xlu0 %v2753_v38 }
 0x35f   : > { %v2594_v45 = vmax.f32 %v2394_v40, 0.0  ;;  %v2386_v46 = vadd.f32 %v4256_v26, %v2385_v44  ;;  %v2756_v47 = vsel %vm1150_vm2, %v2662_v41, 0.0  ;;  %v2660_v48 = vmul.f32 %v4262_v57, %v2589_v39 }
 0x360   : > { %v3662_v49 = vpop.f32.mrf.mxu1  ;;  %2757 = vadd.xlane.f32.xlu1 %v2756_v47 }
 0x361   : > { %v2592_v50 = vmax.f32 %v2386_v46, 0.0  ;;  %v2397_v51 = vadd.f32 %v3662_v49, %v4256_v26  ;;  %v2665_v53 = vmul.f32 %v4262_v57, %v2594_v45  ;;  %v2750_v58 = vsel %vm1150_vm2, %v2660_v48, 0.0 }
 0x362   : > { %v2388_v54 = vpop.f32.mrf.mxu1  ;;  %2748 = vadd.xlane.f32.xlu0 %v2747_v52 }
 0x363   : > { %v2595_v55 = vmax.f32 %v2397_v51, 0.0  ;;  %v2389_v56 = vadd.f32 %v4256_v26, %v2388_v54  ;;  %v2765_v59 = vsel %vm1150_vm2, %v2665_v53, 0.0  ;;  %v2663_v63 = vmul.f32 %v4262_v57, %v2592_v50 }
 0x364   : > { %v3665_v18 = vpop.f32.mrf.mxu1  ;;  %2751 = vadd.xlane.f32.xlu1 %v2750_v58 }
 0x365   : > { %v2593_v60 = vmax.f32 %v2389_v56, 0.0  ;;  %v2410_v61 = vadd.f32 %v3665_v18, %v4256_v26  ;;  %v2666_v62 = vmul.f32 %v4262_v57, %v2595_v55  ;;  %v2759_v8 = vsel %vm1150_vm2, %v2663_v63, 0.0 }
 0x366   : > { %v2401_v0 = vpop.f32.mrf.mxu1  ;;  %2766 = vadd.xlane.f32.xlu0 %v2765_v59 }
 0x367   : > { %v2598_v1 = vmax.f32 %v2410_v61, 0.0  ;;  %v2402_v2 = vadd.f32 %v4256_v26, %v2401_v0  ;;  %v2768_v3 = vsel %vm1150_vm2, %v2666_v62, 0.0  ;;  %v2664_v4 = vmul.f32 %v4262_v57, %v2593_v60 }
 0x368   : > { %v3666_v5 = vpop.f32.mrf.mxu1  ;;  %2769 = vadd.xlane.f32.xlu1 %v2768_v3 }
 0x369   : > { %v2596_v6 = vmax.f32 %v2402_v2, 0.0  ;;  %v2413_v7 = vadd.f32 %v3666_v5, %v4256_v26  ;;  %v2669_v9 = vmul.f32 %v4262_v57, %v2598_v1  ;;  %v2762_v13 = vsel %vm1150_vm2, %v2664_v4, 0.0 }
 0x36a   : > { %v2404_v10 = vpop.f32.mrf.mxu1  ;;  %2760 = vadd.xlane.f32.xlu0 %v2759_v8 }
 0x36b   : > { %v2599_v11 = vmax.f32 %v2413_v7, 0.0  ;;  %v2405_v12 = vadd.f32 %v4256_v26, %v2404_v10  ;;  %v2777_v15 = vsel %vm1150_vm2, %v2669_v9, 0.0  ;;  %v2667_v19 = vmul.f32 %v4262_v57, %v2596_v6 }
 0x36c   : > { %v3669_v14 = vpop.f32.mrf.mxu1  ;;  %2763 = vadd.xlane.f32.xlu1 %v2762_v13 }
 0x36d   : > { %v2597_v43 = vmax.f32 %v2405_v12, 0.0  ;;  %v2426_v16 = vadd.f32 %v3669_v14, %v4256_v26  ;;  %v2670_v17 = vmul.f32 %v4262_v57, %v2599_v11  ;;  %v2771_v29 = vsel %vm1150_vm2, %v2667_v19, 0.0 }
 0x36e   : > { %v2417_v20 = vpop.f32.mrf.mxu1  ;;  %2778 = vadd.xlane.f32.xlu0 %v2777_v15 }
 0x36f   : > { %v2602_v21 = vmax.f32 %v2426_v16, 0.0  ;;  %v2418_v22 = vadd.f32 %v4256_v26, %v2417_v20  ;;  %v2780_v23 = vsel %vm1150_vm2, %v2670_v17, 0.0  ;;  %v2668_v24 = vmul.f32 %v4262_v57, %v2597_v43 }
 0x370   : > { %v3670_v25 = vpop.f32.mrf.mxu1  ;;  %2781 = vadd.xlane.f32.xlu1 %v2780_v23 }
 0x371   : > { %v2600_v27 = vmax.f32 %v2418_v22, 0.0  ;;  %v2429_v28 = vadd.f32 %v3670_v25, %v4256_v26  ;;  %v2673_v30 = vmul.f32 %v4262_v57, %v2602_v21  ;;  %v2774_v34 = vsel %vm1150_vm2, %v2668_v24, 0.0 }
 0x372   : > { %v2420_v31 = vpop.f32.mrf.mxu1  ;;  %2772 = vadd.xlane.f32.xlu0 %v2771_v29 }
 0x373   : > { %v2603_v32 = vmax.f32 %v2429_v28, 0.0  ;;  %v2421_v33 = vadd.f32 %v4256_v26, %v2420_v31  ;;  %v2789_v36 = vsel %vm1150_vm2, %v2673_v30, 0.0  ;;  %v2671_v40 = vmul.f32 %v4262_v57, %v2600_v27 }
 0x374   : > { %v3673_v35 = vpop.f32.mrf.mxu1  ;;  %2775 = vadd.xlane.f32.xlu1 %v2774_v34 }
 0x375   : > { %v2601_v37 = vmax.f32 %v2421_v33, 0.0  ;;  %v2442_v38 = vadd.f32 %v3673_v35, %v4256_v26  ;;  %v2674_v39 = vmul.f32 %v4262_v57, %v2603_v32  ;;  %v2783_v50 = vsel %vm1150_vm2, %v2671_v40, 0.0 }
 0x376   : > { %v2433_v41 = vpop.f32.mrf.mxu1  ;;  %2790 = vadd.xlane.f32.xlu0 %v2789_v36 }
 0x377   : > { %v2606_v42 = vmax.f32 %v2442_v38, 0.0  ;;  %v2434_v44 = vadd.f32 %v4256_v26, %v2433_v41  ;;  %v2792_v45 = vsel %vm1150_vm2, %v2674_v39, 0.0  ;;  %v2672_v46 = vmul.f32 %v4262_v57, %v2601_v37 }
 0x378   : > { %v3674_v47 = vpop.f32.mrf.mxu1  ;;  %2793 = vadd.xlane.f32.xlu1 %v2792_v45 }
 0x379   : > { %v2604_v48 = vmax.f32 %v2434_v44, 0.0  ;;  %v2445_v49 = vadd.f32 %v3674_v47, %v4256_v26  ;;  %v2677_v51 = vmul.f32 %v4262_v57, %v2606_v42  ;;  %v2786_v55 = vsel %vm1150_vm2, %v2672_v46, 0.0 }
 0x37a   : > { %v2436_v52 = vpop.f32.mrf.mxu1  ;;  %2784 = vadd.xlane.f32.xlu0 %v2783_v50 }
 0x37b   : > { %v2607_v53 = vmax.f32 %v2445_v49, 0.0  ;;  %v2437_v54 = vadd.f32 %v4256_v26, %v2436_v52  ;;  %v2801_v58 = vsel %vm1150_vm2, %v2677_v51, 0.0  ;;  %v2675_v61 = vmul.f32 %v4262_v57, %v2604_v48 }
 0x37c   : > { %v3677_v56 = vpop.f32.mrf.mxu1  ;;  %2787 = vadd.xlane.f32.xlu1 %v2786_v55 }
 0x37d   : > { %v2605_v18 = vmax.f32 %v2437_v54, 0.0  ;;  %v2458_v59 = vadd.f32 %v3677_v56, %v4256_v26  ;;  %v2678_v60 = vmul.f32 %v4262_v57, %v2607_v53  ;;  %v2795_v6 = vsel %vm1150_vm2, %v2675_v61, 0.0 }
 0x37e   : > { %v2449_v62 = vpop.f32.mrf.mxu1  ;;  %2802 = vadd.xlane.f32.xlu0 %v2801_v58 }
 0x37f   : > { %v2610_v63 = vmax.f32 %v2458_v59, 0.0  ;;  %v2450_v0 = vadd.f32 %v4256_v26, %v2449_v62  ;;  %v2804_v1 = vsel %vm1150_vm2, %v2678_v60, 0.0  ;;  %v2676_v2 = vmul.f32 %v4262_v57, %v2605_v18 }
 0x380   : > { %v3678_v3 = vpop.f32.mrf.mxu1  ;;  %2805 = vadd.xlane.f32.xlu1 %v2804_v1 }
 0x381   : > { %v2608_v4 = vmax.f32 %v2450_v0, 0.0  ;;  %v2461_v5 = vadd.f32 %v3678_v3, %v4256_v26  ;;  %v2681_v7 = vmul.f32 %v4262_v57, %v2610_v63  ;;  %v2798_v11 = vsel %vm1150_vm2, %v2676_v2, 0.0 }
 0x382   : > { %v2452_v8 = vpop.f32.mrf.mxu1  ;;  %2796 = vadd.xlane.f32.xlu0 %v2795_v6 }
 0x383   : > { %v2611_v9 = vmax.f32 %v2461_v5, 0.0  ;;  %v2453_v10 = vadd.f32 %v4256_v26, %v2452_v8  ;;  %v2813_v13 = vsel %vm1150_vm2, %v2681_v7, 0.0  ;;  %v2679_v16 = vmul.f32 %v4262_v57, %v2608_v4 }
 0x384   : > { %v3681_v12 = vpop.f32.mrf.mxu1  ;;  %2799 = vadd.xlane.f32.xlu1 %v2798_v11 }
 0x385   : > { %v2609_v14 = vmax.f32 %v2453_v10, 0.0  ;;  %v2474_v15 = vadd.f32 %v3681_v12, %v4256_v26  ;;  %v2682_v43 = vmul.f32 %v4262_v57, %v2611_v9  ;;  %v2807_v27 = vsel %vm1150_vm2, %v2679_v16, 0.0 }
 0x386   : > { %v2465_v17 = vpop.f32.mrf.mxu1  ;;  %2814 = vadd.xlane.f32.xlu0 %v2813_v13 }
 0x387   : > { %v2614_v19 = vmax.f32 %v2474_v15, 0.0  ;;  %v2466_v20 = vadd.f32 %v4256_v26, %v2465_v17  ;;  %v2816_v21 = vsel %vm1150_vm2, %v2682_v43, 0.0  ;;  %v2680_v22 = vmul.f32 %v4262_v57, %v2609_v14 }
 0x388   : > { %v3682_v23 = vpop.f32.mrf.mxu1  ;;  %2817 = vadd.xlane.f32.xlu1 %v2816_v21 }
 0x389   : > { %v2612_v24 = vmax.f32 %v2466_v20, 0.0  ;;  %v2477_v25 = vadd.f32 %v3682_v23, %v4256_v26  ;;  %v2685_v28 = vmul.f32 %v4262_v57, %v2614_v19  ;;  %v2810_v32 = vsel %vm1150_vm2, %v2680_v22, 0.0 }
 0x38a   : > { %v2468_v29 = vpop.f32.mrf.mxu1  ;;  %2808 = vadd.xlane.f32.xlu0 %v2807_v27 }
 0x38b   : > { %v2615_v30 = vmax.f32 %v2477_v25, 0.0  ;;  %v2469_v31 = vadd.f32 %v4256_v26, %v2468_v29  ;;  %v2825_v34 = vsel %vm1150_vm2, %v2685_v28, 0.0  ;;  %v2683_v38 = vmul.f32 %v4262_v57, %v2612_v24 }
 0x38c   : > { %v3685_v33 = vpop.f32.mrf.mxu1  ;;  %2811 = vadd.xlane.f32.xlu1 %v2810_v32 }
 0x38d   : > { %v2613_v35 = vmax.f32 %v2469_v31, 0.0  ;;  %v2490_v36 = vadd.f32 %v3685_v33, %v4256_v26  ;;  %v2686_v37 = vmul.f32 %v4262_v57, %v2615_v30  ;;  %v2819_v48 = vsel %vm1150_vm2, %v2683_v38, 0.0 }
 0x38e   : > { %v2481_v39 = vpop.f32.mrf.mxu1  ;;  %2826 = vadd.xlane.f32.xlu0 %v2825_v34 }
 0x38f   : > { %v2618_v40 = vmax.f32 %v2490_v36, 0.0  ;;  %v2482_v41 = vadd.f32 %v4256_v26, %v2481_v39  ;;  %v2828_v42 = vsel %vm1150_vm2, %v2686_v37, 0.0  ;;  %v2684_v44 = vmul.f32 %v4262_v57, %v2613_v35 }
 0x390   : > { %v3686_v45 = vpop.f32.mrf.mxu1  ;;  %2829 = vadd.xlane.f32.xlu1 %v2828_v42 }
 0x391   : > { %v2616_v46 = vmax.f32 %v2482_v41, 0.0  ;;  %v2493_v47 = vadd.f32 %v3686_v45, %v4256_v26  ;;  %v2689_v49 = vmul.f32 %v4262_v57, %v2618_v40  ;;  %v2822_v53 = vsel %vm1150_vm2, %v2684_v44, 0.0 }
 0x392   : > { %v2484_v50 = vpop.f32.mrf.mxu1  ;;  %2820 = vadd.xlane.f32.xlu0 %v2819_v48 }
 0x393   : > { %v2619_v51 = vmax.f32 %v2493_v47, 0.0  ;;  %v2485_v52 = vadd.f32 %v4256_v26, %v2484_v50  ;;  %v2837_v55 = vsel %vm1150_vm2, %v2689_v49, 0.0  ;;  %v2687_v59 = vmul.f32 %v4262_v57, %v2616_v46 }
 0x394   : > { %v3689_v54 = vpop.f32.mrf.mxu1  ;;  %2823 = vadd.xlane.f32.xlu1 %v2822_v53 }
 0x395   : > { %v2617_v56 = vmax.f32 %v2485_v52, 0.0  ;;  %v2506_v58 = vadd.f32 %v3689_v54, %v4256_v26  ;;  %v2690_v18 = vmul.f32 %v4262_v57, %v2619_v51  ;;  %v2831_v4 = vsel %vm1150_vm2, %v2687_v59, 0.0 }
 0x396   : > { %v2497_v60 = vpop.f32.mrf.mxu1  ;;  %2838 = vadd.xlane.f32.xlu0 %v2837_v55 }
 0x397   : > { %v2622_v61 = vmax.f32 %v2506_v58, 0.0  ;;  %v2498_v62 = vadd.f32 %v4256_v26, %v2497_v60  ;;  %v2840_v63 = vsel %vm1150_vm2, %v2690_v18, 0.0  ;;  %v2688_v0 = vmul.f32 %v4262_v57, %v2617_v56 }
 0x398   : > { %v3690_v1 = vpop.f32.mrf.mxu1  ;;  %2841 = vadd.xlane.f32.xlu1 %v2840_v63 }
 0x399   : > { %v2620_v2 = vmax.f32 %v2498_v62, 0.0  ;;  %v2509_v3 = vadd.f32 %v3690_v1, %v4256_v26  ;;  %v2693_v5 = vmul.f32 %v4262_v57, %v2622_v61  ;;  %v2834_v9 = vsel %vm1150_vm2, %v2688_v0, 0.0 }
 0x39a   : > { %v2500_v6 = vpop.f32.mrf.mxu1  ;;  %2832 = vadd.xlane.f32.xlu0 %v2831_v4 }
 0x39b   : > { %v2623_v7 = vmax.f32 %v2509_v3, 0.0  ;;  %v2501_v8 = vadd.f32 %v4256_v26, %v2500_v6  ;;  %v2849_v11 = vsel %vm1150_vm2, %v2693_v5, 0.0  ;;  %v2691_v15 = vmul.f32 %v4262_v57, %v2620_v2 }
 0x39c   : > { %v3693_v10 = vpop.f32.mrf.mxu1  ;;  %2835 = vadd.xlane.f32.xlu1 %v2834_v9 }
 0x39d   : > { %v2621_v12 = vmax.f32 %v2501_v8, 0.0  ;;  %v2522_v13 = vadd.f32 %v3693_v10, %v4256_v26  ;;  %v2694_v14 = vmul.f32 %v4262_v57, %v2623_v7  ;;  %v2843_v24 = vsel %vm1150_vm2, %v2691_v15, 0.0 }
 0x39e   : > { %v2513_v43 = vpop.f32.mrf.mxu1  ;;  %2850 = vadd.xlane.f32.xlu0 %v2849_v11 }
 0x39f   : > { %v2626_v16 = vmax.f32 %v2522_v13, 0.0  ;;  %v2514_v17 = vadd.f32 %v4256_v26, %v2513_v43  ;;  %v2852_v19 = vsel %vm1150_vm2, %v2694_v14, 0.0  ;;  %v2692_v20 = vmul.f32 %v4262_v57, %v2621_v12 }
 0x3a0   : > { %v3694_v21 = vpop.f32.mrf.mxu1  ;;  %2853 = vadd.xlane.f32.xlu1 %v2852_v19 }
 0x3a1   : > { %v2624_v22 = vmax.f32 %v2514_v17, 0.0  ;;  %v2525_v23 = vadd.f32 %v3694_v21, %v4256_v26  ;;  %v2697_v25 = vmul.f32 %v4262_v57, %v2626_v16  ;;  %v2846_v30 = vsel %vm1150_vm2, %v2692_v20, 0.0 }
 0x3a2   : > { %v2516_v27 = vpop.f32.mrf.mxu1  ;;  %2844 = vadd.xlane.f32.xlu0 %v2843_v24 }
 0x3a3   : > { %v2627_v28 = vmax.f32 %v2525_v23, 0.0  ;;  %v2517_v29 = vadd.f32 %v4256_v26, %v2516_v27  ;;  %v2861_v32 = vsel %vm1150_vm2, %v2697_v25, 0.0  ;;  %v2695_v36 = vmul.f32 %v4262_v57, %v2624_v22 }
 0x3a4   : > { %v3697_v31 = vpop.f32.mrf.mxu1  ;;  %2847 = vadd.xlane.f32.xlu1 %v2846_v30 }
 0x3a5   : > { %v2625_v33 = vmax.f32 %v2517_v29, 0.0  ;;  %v2538_v34 = vadd.f32 %v3697_v31, %v4256_v26  ;;  %v2698_v35 = vmul.f32 %v4262_v57, %v2627_v28  ;;  %v2855_v46 = vsel %vm1150_vm2, %v2695_v36, 0.0  ;;  %v4456_v36 = vld [vmem:[#allocation2] ss:$0 sm:$0xff] }
 0x3a6   : > { %v2529_v37 = vpop.f32.mrf.mxu1  ;;  %2862 = vadd.xlane.f32.xlu0 %v2861_v32 }
 0x3a7   : > { %v2630_v38 = vmax.f32 %v2538_v34, 0.0  ;;  %v2530_v39 = vadd.f32 %v4256_v26, %v2529_v37  ;;  %v2864_v40 = vsel %vm1150_vm2, %v2698_v35, 0.0  ;;  %v2696_v41 = vmul.f32 %v4262_v57, %v2625_v33 }
 0x3a8   : > { %v3698_v42 = vpop.f32.mrf.mxu1  ;;  %2865 = vadd.xlane.f32.xlu1 %v2864_v40 }
 0x3a9   : > { %v2628_v44 = vmax.f32 %v2530_v39, 0.0  ;;  %v2541_v45 = vadd.f32 %v3698_v42, %v4256_v26  ;;  %v2701_v47 = vmul.f32 %v4262_v57, %v2630_v38  ;;  %v2858_v51 = vsel %vm1150_vm2, %v2696_v41, 0.0 }
 0x3aa   : > { %v2532_v48 = vpop.f32.mrf.mxu1  ;;  %2856 = vadd.xlane.f32.xlu0 %v2855_v46 }
 0x3ab   : > { %v2631_v49 = vmax.f32 %v2541_v45, 0.0  ;;  %v2533_v50 = vadd.f32 %v4256_v26, %v2532_v48  ;;  %v2873_v53 = vsel %vm1150_vm2, %v2701_v47, 0.0  ;;  %v2699_v58 = vmul.f32 %v4262_v57, %v2628_v44 }
 0x3ac   : > { %v3701_v52 = vpop.f32.mrf.mxu1  ;;  %2859 = vadd.xlane.f32.xlu1 %v2858_v51 }
 0x3ad   : > { %v2629_v54 = vmax.f32 %v2533_v50, 0.0  ;;  %v2554_v55 = vadd.f32 %v3701_v52, %v4256_v26  ;;  %v2702_v56 = vmul.f32 %v4262_v57, %v2631_v49  ;;  %v2867_v2 = vsel %vm1150_vm2, %v2699_v58, 0.0 }
 0x3ae   : > { %v2545_v18 = vpop.f32.mrf.mxu1  ;;  %2874 = vadd.xlane.f32.xlu0 %v2873_v53 }
 0x3af   : > { %v2634_v59 = vmax.f32 %v2554_v55, 0.0  ;;  %v2546_v60 = vadd.f32 %v4256_v26, %v2545_v18  ;;  %v2876_v61 = vsel %vm1150_vm2, %v2702_v56, 0.0  ;;  %v2700_v62 = vmul.f32 %v4262_v57, %v2629_v54 }
 0x3b0   : > { %v3702_v63 = vpop.f32.mrf.mxu1  ;;  %2877 = vadd.xlane.f32.xlu1 %v2876_v61 }
 0x3b1   : > { %v2632_v0 = vmax.f32 %v2546_v60, 0.0  ;;  %v2557_v1 = vadd.f32 %v3702_v63, %v4256_v26  ;;  %v2705_v3 = vmul.f32 %v4262_v57, %v2634_v59  ;;  %v2870_v7 = vsel %vm1150_vm2, %v2700_v62, 0.0 }
 0x3b2   : > { %v2548_v4 = vpop.f32.mrf.mxu1  ;;  %2868 = vadd.xlane.f32.xlu0 %v2867_v2 }
 0x3b3   : > { %v2635_v5 = vmax.f32 %v2557_v1, 0.0  ;;  %v2549_v6 = vadd.f32 %v4256_v26, %v2548_v4  ;;  %v2885_v9 = vsel %vm1150_vm2, %v2705_v3, 0.0  ;;  %v2703_v13 = vmul.f32 %v4262_v57, %v2632_v0 }
 0x3b4   : > { %v3705_v8 = vpop.f32.mrf.mxu1  ;;  %2871 = vadd.xlane.f32.xlu1 %v2870_v7 }
 0x3b5   : > { %v2633_v10 = vmax.f32 %v2549_v6, 0.0  ;;  %v2570_v11 = vadd.f32 %v3705_v8, %v4256_v26  ;;  %v2706_v12 = vmul.f32 %v4262_v57, %v2635_v5  ;;  %v2879_v22 = vsel %vm1150_vm2, %v2703_v13, 0.0 }
 0x3b6   : > { %v2561_v14 = vpop.f32.mrf.mxu1  ;;  %2886 = vadd.xlane.f32.xlu0 %v2885_v9 }
 0x3b7   : > { %v2562_v15 = vadd.f32 %v4256_v26, %v2561_v14  ;;  %v2888_v43 = vsel %vm1150_vm2, %v2706_v12, 0.0  ;;  %v2704_v16 = vmul.f32 %v4262_v57, %v2633_v10  ;;  %v2638_v19 = vmax.f32 %v2570_v11, 0.0 }
 0x3b8   : > { %v3706_v17 = vpop.f32.mrf.mxu1  ;;  %2889 = vadd.xlane.f32.xlu1 %v2888_v43 }
 0x3b9   : > { %v2636_v20 = vmax.f32 %v2562_v15, 0.0  ;;  %v2573_v21 = vadd.f32 %v3706_v17, %v4256_v26  ;;  %v2882_v25 = vsel %vm1150_vm2, %v2704_v16, 0.0  ;;  %v2709_v31 = vmul.f32 %v4262_v57, %v2638_v19 }
 0x3ba   : > { %v2564_v23 = vpop.f32.mrf.mxu1  ;;  %2880 = vadd.xlane.f32.xlu0 %v2879_v22 }
 0x3bb   : > { %v2565_v24 = vadd.f32 %v4256_v26, %v2564_v23  ;;  %v2707_v27 = vmul.f32 %v4262_v57, %v2636_v20  ;;  %v2639_v28 = vmax.f32 %v2573_v21, 0.0  ;;  %v2897_v34 = vsel %vm1150_vm2, %v2709_v31, 0.0 }
 0x3bc   : > { %2883 = vadd.xlane.f32.xlu1 %v2882_v25 }
 0x3bd   : > { %v2637_v29 = vmax.f32 %v2565_v24, 0.0  ;;  %v2891_v30 = vsel %vm1150_vm2, %v2707_v27, 0.0  ;;  %v2710_v26 = vmul.f32 %v4262_v57, %v2639_v28 }
 0x3be   : > { %2892 = vadd.xlane.f32.xlu0 %v2891_v30 }
 0x3bf   : > { %v2708_v32 = vmul.f32 %v4262_v57, %v2637_v29  ;;  %v2900_v35 = vsel %vm1150_vm2, %v2710_v26, 0.0 }
 0x3c1   : > { %v2894_v33 = vsel %vm1150_vm2, %v2708_v32, 0.0 }
 0x3c2   : > { %2895 = vadd.xlane.f32.xlu1 %v2894_v33  ;;  %2898 = vadd.xlane.f32.xlu0 %v2897_v34 }
 0x3c6   : > { %2901 = vadd.xlane.f32.xlu1 %v2900_v35 }
 0x3cd   : > { %v2719_v57 = vpop.xlane.xlu1 %2718 }
 0x3ce   : > { %v2912_v37 = vadd.f32 %v4456_v36, %v2719_v57 }
 0x3cf   : > { %v2713_v38 = vpop.xlane.xlu0 %2712 }
 0x3d0   : > { %2977 = vst.msk [vmem:[%s4461_s28 + $0x10] sm:$0xff] %vm2974_vm3, %v2912_v37  ;;  %v2910_v39 = vadd.f32 %v4456_v36, %v2713_v38 }
 0x3d1   : > { %v2722_v40 = vpop.xlane.xlu1 %2721 }
 0x3d2   : > { %2975 = vst.msk [vmem:[%s4461_s28] sm:$0xff] %vm2974_vm3, %v2910_v39  ;;  %v2913_v41 = vadd.f32 %v4456_v36, %v2722_v40 }
 0x3d3   : > { %v2716_v42 = vpop.xlane.xlu0 %2715 }
 0x3d4   : > { %2978 = vst.msk [vmem:[%s4461_s28 + $0x18] sm:$0xff] %vm2974_vm3, %v2913_v41  ;;  %v2911_v44 = vadd.f32 %v4456_v36, %v2716_v42 }
 0x3d6   : > { %2976 = vst.msk [vmem:[%s4461_s28 + $0x8] sm:$0xff] %vm2974_vm3, %v2911_v44 }
 0x3d7   : > { %v2731_v45 = vpop.xlane.xlu0 %2730 }
 0x3d8   : > { %v2916_v46 = vadd.f32 %v4456_v36, %v2731_v45 }
 0x3d9   : > { %v2734_v47 = vpop.xlane.xlu1 %2733 }
 0x3da   : > { %2981 = vst.msk [vmem:[%s4461_s28 + $0x30] sm:$0xff] %vm2974_vm3, %v2916_v46  ;;  %v2917_v48 = vadd.f32 %v4456_v36, %v2734_v47 }
 0x3db   : > { %v2725_v49 = vpop.xlane.xlu0 %2724 }
 0x3dc   : > { %2982 = vst.msk [vmem:[%s4461_s28 + $0x38] sm:$0xff] %vm2974_vm3, %v2917_v48  ;;  %v2914_v50 = vadd.f32 %v4456_v36, %v2725_v49 }
 0x3dd   : > { %v2728_v51 = vpop.xlane.xlu1 %2727 }
 0x3de   : > { %2979 = vst.msk [vmem:[%s4461_s28 + $0x20] sm:$0xff] %vm2974_vm3, %v2914_v50  ;;  %v2915_v52 = vadd.f32 %v4456_v36, %v2728_v51 }
 0x3df   : > { %v2743_v53 = vpop.xlane.xlu0 %2742 }
 0x3e0   : > { %2980 = vst.msk [vmem:[%s4461_s28 + $0x28] sm:$0xff] %vm2974_vm3, %v2915_v52  ;;  %v2920_v54 = vadd.f32 %v4456_v36, %v2743_v53 }
 0x3e1   : > { %v2746_v55 = vpop.xlane.xlu1 %2745 }
 0x3e2   : > { %2985 = vst.msk [vmem:[%s4461_s28 + $0x50] sm:$0xff] %vm2974_vm3, %v2920_v54  ;;  %v2921_v56 = vadd.f32 %v4456_v36, %v2746_v55 }
 0x3e3   : > { %v2737_v58 = vpop.xlane.xlu0 %2736 }
 0x3e4   : > { %2986 = vst.msk [vmem:[%s4461_s28 + $0x58] sm:$0xff] %vm2974_vm3, %v2921_v56  ;;  %v2918_v18 = vadd.f32 %v4456_v36, %v2737_v58 }
 0x3e5   : > { %v2740_v59 = vpop.xlane.xlu1 %2739 }
 0x3e6   : > { %2983 = vst.msk [vmem:[%s4461_s28 + $0x40] sm:$0xff] %vm2974_vm3, %v2918_v18  ;;  %v2919_v60 = vadd.f32 %v4456_v36, %v2740_v59 }
 0x3e7   : > { %v2755_v61 = vpop.xlane.xlu0 %2754 }
 0x3e8   : > { %2984 = vst.msk [vmem:[%s4461_s28 + $0x48] sm:$0xff] %vm2974_vm3, %v2919_v60  ;;  %v2924_v62 = vadd.f32 %v4456_v36, %v2755_v61 }
 0x3e9   : > { %v2758_v63 = vpop.xlane.xlu1 %2757 }
 0x3ea   : > { %2989 = vst.msk [vmem:[%s4461_s28 + $0x70] sm:$0xff] %vm2974_vm3, %v2924_v62  ;;  %v2925_v0 = vadd.f32 %v4456_v36, %v2758_v63 }
 0x3eb   : > { %v2749_v1 = vpop.xlane.xlu0 %2748 }
 0x3ec   : > { %2990 = vst.msk [vmem:[%s4461_s28 + $0x78] sm:$0xff] %vm2974_vm3, %v2925_v0  ;;  %v2922_v2 = vadd.f32 %v4456_v36, %v2749_v1 }
 0x3ed   : > { %v2752_v3 = vpop.xlane.xlu1 %2751 }
 0x3ee   : > { %2987 = vst.msk [vmem:[%s4461_s28 + $0x60] sm:$0xff] %vm2974_vm3, %v2922_v2  ;;  %v2923_v4 = vadd.f32 %v4456_v36, %v2752_v3 }
 0x3ef   : > { %v2767_v5 = vpop.xlane.xlu0 %2766 }
 0x3f0   : > { %2988 = vst.msk [vmem:[%s4461_s28 + $0x68] sm:$0xff] %vm2974_vm3, %v2923_v4  ;;  %v2928_v6 = vadd.f32 %v4456_v36, %v2767_v5 }
 0x3f1   : > { %v2770_v7 = vpop.xlane.xlu1 %2769 }
 0x3f2   : > { %2993 = vst.msk [vmem:[%s4461_s28 + $0x90] sm:$0xff] %vm2974_vm3, %v2928_v6  ;;  %v2929_v8 = vadd.f32 %v4456_v36, %v2770_v7 }
 0x3f3   : > { %v2761_v9 = vpop.xlane.xlu0 %2760 }
 0x3f4   : > { %2994 = vst.msk [vmem:[%s4461_s28 + $0x98] sm:$0xff] %vm2974_vm3, %v2929_v8  ;;  %v2926_v10 = vadd.f32 %v4456_v36, %v2761_v9 }
 0x3f5   : > { %v2764_v11 = vpop.xlane.xlu1 %2763 }
 0x3f6   : > { %2991 = vst.msk [vmem:[%s4461_s28 + $0x80] sm:$0xff] %vm2974_vm3, %v2926_v10  ;;  %v2927_v12 = vadd.f32 %v4456_v36, %v2764_v11 }
 0x3f7   : > { %v2779_v13 = vpop.xlane.xlu0 %2778 }
 0x3f8   : > { %2992 = vst.msk [vmem:[%s4461_s28 + $0x88] sm:$0xff] %vm2974_vm3, %v2927_v12  ;;  %v2932_v14 = vadd.f32 %v4456_v36, %v2779_v13 }
 0x3f9   : > { %v2782_v15 = vpop.xlane.xlu1 %2781 }
 0x3fa   : > { %2997 = vst.msk [vmem:[%s4461_s28 + $0xb0] sm:$0xff] %vm2974_vm3, %v2932_v14  ;;  %v2933_v43 = vadd.f32 %v4456_v36, %v2782_v15 }
 0x3fb   : > { %v2773_v16 = vpop.xlane.xlu0 %2772 }
 0x3fc   : > { %2998 = vst.msk [vmem:[%s4461_s28 + $0xb8] sm:$0xff] %vm2974_vm3, %v2933_v43  ;;  %v2930_v17 = vadd.f32 %v4456_v36, %v2773_v16 }
 0x3fd   : > { %v2776_v19 = vpop.xlane.xlu1 %2775 }
 0x3fe   : > { %2995 = vst.msk [vmem:[%s4461_s28 + $0xa0] sm:$0xff] %vm2974_vm3, %v2930_v17  ;;  %v2931_v20 = vadd.f32 %v4456_v36, %v2776_v19 }
 0x3ff   : > { %v2791_v21 = vpop.xlane.xlu0 %2790 }
 0x400   : > { %2996 = vst.msk [vmem:[%s4461_s28 + $0xa8] sm:$0xff] %vm2974_vm3, %v2931_v20  ;;  %v2936_v22 = vadd.f32 %v4456_v36, %v2791_v21 }
 0x401   : > { %v2794_v23 = vpop.xlane.xlu1 %2793 }
 0x402   : > { %3001 = vst.msk [vmem:[%s4461_s28 + $0xd0] sm:$0xff] %vm2974_vm3, %v2936_v22  ;;  %v2937_v24 = vadd.f32 %v4456_v36, %v2794_v23 }
 0x403   : > { %v2785_v25 = vpop.xlane.xlu0 %2784 }
 0x404   : > { %3002 = vst.msk [vmem:[%s4461_s28 + $0xd8] sm:$0xff] %vm2974_vm3, %v2937_v24  ;;  %v2934_v27 = vadd.f32 %v4456_v36, %v2785_v25 }
 0x405   : > { %v2788_v28 = vpop.xlane.xlu1 %2787 }
 0x406   : > { %2999 = vst.msk [vmem:[%s4461_s28 + $0xc0] sm:$0xff] %vm2974_vm3, %v2934_v27  ;;  %v2935_v29 = vadd.f32 %v4456_v36, %v2788_v28 }
 0x407   : > { %v2803_v30 = vpop.xlane.xlu0 %2802 }
 0x408   : > { %3000 = vst.msk [vmem:[%s4461_s28 + $0xc8] sm:$0xff] %vm2974_vm3, %v2935_v29  ;;  %v2940_v31 = vadd.f32 %v4456_v36, %v2803_v30 }
 0x409   : > { %v2806_v32 = vpop.xlane.xlu1 %2805 }
 0x40a   : > { %3005 = vst.msk [vmem:[%s4461_s28 + $0xf0] sm:$0xff] %vm2974_vm3, %v2940_v31  ;;  %v2941_v33 = vadd.f32 %v4456_v36, %v2806_v32 }
 0x40b   : > { %v2797_v34 = vpop.xlane.xlu0 %2796 }
 0x40c   : > { %3006 = vst.msk [vmem:[%s4461_s28 + $0xf8] sm:$0xff] %vm2974_vm3, %v2941_v33  ;;  %v2938_v26 = vadd.f32 %v4456_v36, %v2797_v34 }
 0x40d   : > { %v2800_v35 = vpop.xlane.xlu1 %2799 }
 0x40e   : > { %3003 = vst.msk [vmem:[%s4461_s28 + $0xe0] sm:$0xff] %vm2974_vm3, %v2938_v26  ;;  %v2939_v57 = vadd.f32 %v4456_v36, %v2800_v35 }
 0x40f   : > { %v2815_v37 = vpop.xlane.xlu0 %2814 }
 0x410   : > { %3004 = vst.msk [vmem:[%s4461_s28 + $0xe8] sm:$0xff] %vm2974_vm3, %v2939_v57  ;;  %v2944_v38 = vadd.f32 %v4456_v36, %v2815_v37 }
 0x411   : > { %v2818_v39 = vpop.xlane.xlu1 %2817 }
 0x412   : > { %3009 = vst.msk [vmem:[%s4461_s28 + $0x110] sm:$0xff] %vm2974_vm3, %v2944_v38  ;;  %v2945_v40 = vadd.f32 %v4456_v36, %v2818_v39 }
 0x413   : > { %v2809_v41 = vpop.xlane.xlu0 %2808 }
 0x414   : > { %3010 = vst.msk [vmem:[%s4461_s28 + $0x118] sm:$0xff] %vm2974_vm3, %v2945_v40  ;;  %v2942_v42 = vadd.f32 %v4456_v36, %v2809_v41 }
 0x415   : > { %v2812_v44 = vpop.xlane.xlu1 %2811 }
 0x416   : > { %3007 = vst.msk [vmem:[%s4461_s28 + $0x100] sm:$0xff] %vm2974_vm3, %v2942_v42  ;;  %v2943_v45 = vadd.f32 %v4456_v36, %v2812_v44 }
 0x417   : > { %v2827_v46 = vpop.xlane.xlu0 %2826 }
 0x418   : > { %3008 = vst.msk [vmem:[%s4461_s28 + $0x108] sm:$0xff] %vm2974_vm3, %v2943_v45  ;;  %v2948_v47 = vadd.f32 %v4456_v36, %v2827_v46 }
 0x419   : > { %v2830_v48 = vpop.xlane.xlu1 %2829 }
 0x41a   : > { %3013 = vst.msk [vmem:[%s4461_s28 + $0x130] sm:$0xff] %vm2974_vm3, %v2948_v47  ;;  %v2949_v49 = vadd.f32 %v4456_v36, %v2830_v48 }
 0x41b   : > { %v2821_v50 = vpop.xlane.xlu0 %2820 }
 0x41c   : > { %3014 = vst.msk [vmem:[%s4461_s28 + $0x138] sm:$0xff] %vm2974_vm3, %v2949_v49  ;;  %v2946_v51 = vadd.f32 %v4456_v36, %v2821_v50 }
 0x41d   : > { %v2824_v52 = vpop.xlane.xlu1 %2823 }
 0x41e   : > { %3011 = vst.msk [vmem:[%s4461_s28 + $0x120] sm:$0xff] %vm2974_vm3, %v2946_v51  ;;  %v2947_v53 = vadd.f32 %v4456_v36, %v2824_v52 }
 0x41f   : > { %v2839_v54 = vpop.xlane.xlu0 %2838 }
 0x420   : > { %3012 = vst.msk [vmem:[%s4461_s28 + $0x128] sm:$0xff] %vm2974_vm3, %v2947_v53  ;;  %v2952_v55 = vadd.f32 %v4456_v36, %v2839_v54 }
 0x421   : > { %v2842_v56 = vpop.xlane.xlu1 %2841 }
 0x422   : > { %3017 = vst.msk [vmem:[%s4461_s28 + $0x150] sm:$0xff] %vm2974_vm3, %v2952_v55  ;;  %v2953_v58 = vadd.f32 %v4456_v36, %v2842_v56 }
 0x423   : > { %v2833_v18 = vpop.xlane.xlu0 %2832 }
 0x424   : > { %3018 = vst.msk [vmem:[%s4461_s28 + $0x158] sm:$0xff] %vm2974_vm3, %v2953_v58  ;;  %v2950_v59 = vadd.f32 %v4456_v36, %v2833_v18 }
 0x425   : > { %v2836_v60 = vpop.xlane.xlu1 %2835 }
 0x426   : > { %3015 = vst.msk [vmem:[%s4461_s28 + $0x140] sm:$0xff] %vm2974_vm3, %v2950_v59  ;;  %v2951_v61 = vadd.f32 %v4456_v36, %v2836_v60 }
 0x427   : > { %v2851_v62 = vpop.xlane.xlu0 %2850 }
 0x428   : > { %3016 = vst.msk [vmem:[%s4461_s28 + $0x148] sm:$0xff] %vm2974_vm3, %v2951_v61  ;;  %v2956_v63 = vadd.f32 %v4456_v36, %v2851_v62 }
 0x429   : > { %v2854_v0 = vpop.xlane.xlu1 %2853 }
 0x42a   : > { %3021 = vst.msk [vmem:[%s4461_s28 + $0x170] sm:$0xff] %vm2974_vm3, %v2956_v63  ;;  %v2957_v1 = vadd.f32 %v4456_v36, %v2854_v0 }
 0x42b   : > { %v2845_v2 = vpop.xlane.xlu0 %2844 }
 0x42c   : > { %3022 = vst.msk [vmem:[%s4461_s28 + $0x178] sm:$0xff] %vm2974_vm3, %v2957_v1  ;;  %v2954_v3 = vadd.f32 %v4456_v36, %v2845_v2 }
 0x42d   : > { %v2848_v4 = vpop.xlane.xlu1 %2847 }
 0x42e   : > { %3019 = vst.msk [vmem:[%s4461_s28 + $0x160] sm:$0xff] %vm2974_vm3, %v2954_v3  ;;  %v2955_v5 = vadd.f32 %v4456_v36, %v2848_v4 }
 0x42f   : > { %v2863_v6 = vpop.xlane.xlu0 %2862 }
 0x430   : > { %3020 = vst.msk [vmem:[%s4461_s28 + $0x168] sm:$0xff] %vm2974_vm3, %v2955_v5  ;;  %v2960_v7 = vadd.f32 %v4456_v36, %v2863_v6 }
 0x431   : > { %v2866_v8 = vpop.xlane.xlu1 %2865 }
 0x432   : > { %3025 = vst.msk [vmem:[%s4461_s28 + $0x190] sm:$0xff] %vm2974_vm3, %v2960_v7  ;;  %v2961_v9 = vadd.f32 %v4456_v36, %v2866_v8 }
 0x433   : > { %v2857_v10 = vpop.xlane.xlu0 %2856 }
 0x434   : > { %3026 = vst.msk [vmem:[%s4461_s28 + $0x198] sm:$0xff] %vm2974_vm3, %v2961_v9  ;;  %v2958_v11 = vadd.f32 %v4456_v36, %v2857_v10 }
 0x435   : > { %v2860_v12 = vpop.xlane.xlu1 %2859 }
 0x436   : > { %3023 = vst.msk [vmem:[%s4461_s28 + $0x180] sm:$0xff] %vm2974_vm3, %v2958_v11  ;;  %v2959_v13 = vadd.f32 %v4456_v36, %v2860_v12 }
 0x437   : > { %v2875_v14 = vpop.xlane.xlu0 %2874 }
 0x438   : > { %3024 = vst.msk [vmem:[%s4461_s28 + $0x188] sm:$0xff] %vm2974_vm3, %v2959_v13  ;;  %v2964_v15 = vadd.f32 %v4456_v36, %v2875_v14 }
 0x439   : > { %v2878_v43 = vpop.xlane.xlu1 %2877 }
 0x43a   : > { %3029 = vst.msk [vmem:[%s4461_s28 + $0x1b0] sm:$0xff] %vm2974_vm3, %v2964_v15  ;;  %v2965_v16 = vadd.f32 %v4456_v36, %v2878_v43 }
 0x43b   : > { %v2869_v17 = vpop.xlane.xlu0 %2868 }
 0x43c   : > { %3030 = vst.msk [vmem:[%s4461_s28 + $0x1b8] sm:$0xff] %vm2974_vm3, %v2965_v16  ;;  %v2962_v19 = vadd.f32 %v4456_v36, %v2869_v17 }
 0x43d   : > { %v2872_v20 = vpop.xlane.xlu1 %2871 }
 0x43e   : > { %3027 = vst.msk [vmem:[%s4461_s28 + $0x1a0] sm:$0xff] %vm2974_vm3, %v2962_v19  ;;  %v2963_v21 = vadd.f32 %v4456_v36, %v2872_v20 }
 0x43f   : > { %v2887_v22 = vpop.xlane.xlu0 %2886 }
 0x440   : > { %3028 = vst.msk [vmem:[%s4461_s28 + $0x1a8] sm:$0xff] %vm2974_vm3, %v2963_v21  ;;  %v2968_v23 = vadd.f32 %v4456_v36, %v2887_v22 }
 0x441   : > { %v2890_v24 = vpop.xlane.xlu1 %2889 }
 0x442   : > { %3033 = vst.msk [vmem:[%s4461_s28 + $0x1d0] sm:$0xff] %vm2974_vm3, %v2968_v23  ;;  %v2969_v25 = vadd.f32 %v4456_v36, %v2890_v24 }
 0x443   : > { %v2881_v27 = vpop.xlane.xlu0 %2880 }
 0x444   : > { %3034 = vst.msk [vmem:[%s4461_s28 + $0x1d8] sm:$0xff] %vm2974_vm3, %v2969_v25  ;;  %v2966_v28 = vadd.f32 %v4456_v36, %v2881_v27 }
 0x445   : > { %v2884_v29 = vpop.xlane.xlu1 %2883 }
 0x446   : > { %3031 = vst.msk [vmem:[%s4461_s28 + $0x1c0] sm:$0xff] %vm2974_vm3, %v2966_v28  ;;  %v2967_v30 = vadd.f32 %v4456_v36, %v2884_v29 }
 0x447   : > { %v2893_v31 = vpop.xlane.xlu0 %2892 }
 0x448   : > { %3032 = vst.msk [vmem:[%s4461_s28 + $0x1c8] sm:$0xff] %vm2974_vm3, %v2967_v30  ;;  %v2970_v32 = vadd.f32 %v4456_v36, %v2893_v31 }
 0x44a   : > { %3035 = vst.msk [vmem:[%s4461_s28 + $0x1e0] sm:$0xff] %vm2974_vm3, %v2970_v32 }
 0x44b   : > { %v2896_v33 = vpop.xlane.xlu1 %2895  ;;  %v2899_v34 = vpop.xlane.xlu0 %2898 }
 0x44c   : > { %v2971_v26 = vadd.f32 %v4456_v36, %v2896_v33  ;;  %v2972_v35 = vadd.f32 %v4456_v36, %v2899_v34 }
 0x44e   : > { %3036 = vst.msk [vmem:[%s4461_s28 + $0x1e8] sm:$0xff] %vm2974_vm3, %v2971_v26  ;;  %3037 = vst.msk [vmem:[%s4461_s28 + $0x1f0] sm:$0xff] %vm2974_vm3, %v2972_v35 }
 0x44f   : > { %v2902_v57 = vpop.xlane.xlu1 %2901 }
 0x450   : > { %v2973_v37 = vadd.f32 %v4456_v36, %v2902_v57 }
 0x452   : > { %3038 = vst.msk [vmem:[%s4461_s28 + $0x1f8] sm:$0xff] %vm2974_vm3, %v2973_v37 }
 0x453 PF: > { %s23_s19 = sadd.s32 1, %s3766_s19  }
 0x454   : > { %p20_p4 = scmp.ge.s32.totalorder %s23_s19, 4  }
 0x456   :  { %22 = sbr.rel (!%p20_p4) target bundleno = 3 (0x3), region = 94 }

</bundles_post_ra>
